<compile_context>
chip_gen: v6e
topology: v6e:2x2x1
jax: 0.10.0
libtpu: 0.0.40
codegen_flags: <defaults>
</compile_context>

<pallas_src>
import functools

import numpy as np
import jax
import jax.numpy as jnp
from jax.experimental import pallas as pl
from jax.experimental.pallas import tpu as pltpu


def _round_up(x, m):
    return ((x + m - 1) // m) * m


OUT_LANES = 128  # lane-dense output width; final scalar broadcast across lanes


# -----------------------------------------------------------------------------
# Fused kernel: CSG2A core + feed_forward + finetune head
# -----------------------------------------------------------------------------
def fused_kernel(bgex_ref, comp_ref, w_qstack_ref, w_tstack_ref, w_ff_t_ref,
                 const_g_ref, w_proj_ref, b_proj_ref, w1_ref, w2_ref,
                 const_h_ref, out_ref, *, inv_sqrt_h):
    f32 = jnp.float32
    bf16 = jnp.bfloat16

    bgex = bgex_ref[...]                 # (Bt, G) raw b_gex
    cp = comp_ref[...]                   # (Bt, G) comp

    ppi_rowsum = const_g_ref[0:1, :]
    ln_gamma = const_g_ref[1:2, :]
    ln_beta = const_g_ref[2:3, :]
    scale = const_g_ref[3:4, :]          # scalar (broadcast along lanes)
    shift = const_g_ref[4:5, :]          # scalar_bias * scalar (broadcast)

    # scaling_layer: (b_gex + bias) * scalar  ==  b_gex*scalar + bias*scalar
    bg = bgex * scale + shift            # scaled_gex (Bt, G)

    # ---- CSG2A core (f32 MXU; LayerNorm path kept full precision) ----
    # s[b,h] = sum_k q[b,k,h] with q = bg[...,None]*w_gex + cp[...,None]*w_comp
    x = jnp.concatenate([bg, cp], axis=1)                               # (Bt, 2G)
    s = jnp.dot(x, w_qstack_ref[...], preferred_element_type=f32)       # (Bt, H)
    t = jnp.dot(s, w_tstack_ref[...], preferred_element_type=f32)       # (Bt, 2G)
    g = t.shape[-1] // 2
    t_gex, t_comp = t[:, :g], t[:, g:]

    # sum_k (q q^T / sqrt(H) + ppi)[b,i,k] without materializing the (G,G) score
    row_sum = (bg * t_gex + cp * t_comp) * inv_sqrt_h + ppi_rowsum
    pred = bg * row_sum                                                 # (Bt, G)

    # feed_forward: LayerNorm -> ReLU -> Dropout(eval: identity) -> Linear (no bias)
    # TODO(synk): Dropout emitted in eval mode; training-mode masking not implemented.
    mean = jnp.mean(pred, axis=-1, keepdims=True)
    var = jnp.mean((pred - mean) ** 2, axis=-1, keepdims=True)
    normed = (pred - mean) * jax.lax.rsqrt(var + 1e-5)
    normed = normed * ln_gamma + ln_beta
    act = jnp.maximum(normed, 0.0)
    pred_gex = jnp.dot(act, w_ff_t_ref[...], preferred_element_type=f32)  # (Bt, G)

    # ---- finetune head (bf16 MXU operands, f32 accumulation / elementwise) ----
    def proj(x_f32, idx):
        z = jnp.dot(x_f32.astype(bf16), w_proj_ref[idx],
                    preferred_element_type=f32) + b_proj_ref[idx:idx + 1, :]
        return jnp.maximum(z, 0.0)

    hb = proj(bgex, 0)           # bgex_proj(raw b_gex)
    ha = proj(pred_gex, 1)       # agex_proj(pred_gex)
    hc = proj(cp, 2)             # comp_proj(comp)

    hcat = jnp.concatenate([hb, ha, hc], axis=1).astype(bf16)           # (Bt, 3*H1)
    z1 = jnp.dot(hcat, w1_ref[...], preferred_element_type=f32) + b_proj_ref[3:4, :]
    h1 = jnp.maximum(z1, 0.0)
    z2 = (jnp.dot(h1.astype(bf16), w2_ref[...], preferred_element_type=f32)
          + const_h_ref[0:1, :])
    h2 = jnp.maximum(z2, 0.0)

    # final Linear(H2, 1) as a lane reduction; broadcast to a lane-dense slab
    res = (jnp.sum(h2 * const_h_ref[1:2, :], axis=-1, keepdims=True)
           + const_h_ref[2:3, 0:1])
    out_ref[...] = jnp.broadcast_to(res, out_ref.shape).astype(out_ref.dtype)


def _fold_bn_into_linear(W, b, bn, eps=1e-5):
    """Linear(out,in) followed by eval-mode BatchNorm1d -> x @ W_eff + b_eff."""
    s = bn["gamma"] / jnp.sqrt(bn["var"] + eps)
    W_eff = W.T.astype(jnp.float32) * s[None, :]
    b_eff = ((b - bn["mean"]) * s + bn["beta"])[None, :].astype(jnp.float32)
    return W_eff, b_eff


def csg2a_finetune_pallas(b_gex, comp, params, *, block_b=None):
    """Fused CSG2A + finetune head. Returns output of shape (B, 1)."""
    f32 = jnp.float32
    bf16 = jnp.bfloat16
    B, G = b_gex.shape
    H = params["w_gex"].shape[1]

    # --- CSG2A core weights (stay f32) ---
    w_gex = params["w_gex"].astype(f32)
    w_comp = params["w_comp"].astype(f32)
    w_qstack = jnp.concatenate([w_gex, w_comp], axis=0)                 # (2G, H)
    w_tstack = jnp.concatenate([w_gex.T, w_comp.T], axis=1)             # (H, 2G)
    w_ff_t = params["w_ff"].astype(f32).T                               # (G, G)

    scalar = params["scalar"].astype(f32)
    scalar_bias = params["scalar_bias"].astype(f32)
    const_g = jnp.concatenate([
        jnp.sum(params["ppi_adj"].astype(f32), axis=-1)[None, :],       # ppi row sums
        params["ln_gamma"].astype(f32)[None, :],
        params["ln_beta"].astype(f32)[None, :],
        jnp.broadcast_to(scalar, (1, G)),
        jnp.broadcast_to(scalar_bias * scalar, (1, G)),
    ], axis=0)                                                          # (5, G)

    # --- head weights (BatchNorm folded, eval mode); bf16 MXU operands ---
    Wb, bb = _fold_bn_into_linear(params["bgex_proj"]["W"], params["bgex_proj"]["b"],
                                  params["bgex_proj"]["bn"])
    Wa, ba = _fold_bn_into_linear(params["agex_proj"]["W"], params["agex_proj"]["b"],
                                  params["agex_proj"]["bn"])
    Wc, bc = _fold_bn_into_linear(params["comp_proj"]["W"], params["comp_proj"]["b"],
                                  params["comp_proj"]["bn"])
    head = params["pred_head"]
    W1, b1 = _fold_bn_into_linear(head["W1"], head["b1"], head["bn1"])
    W2, b2 = _fold_bn_into_linear(head["W2"], head["b2"], head["bn2"])
    H1 = Wb.shape[1]
    H2 = W2.shape[1]

    w_proj = jnp.stack([Wb, Wa, Wc], axis=0).astype(bf16)               # (3, G, H1)
    b_proj = jnp.concatenate([bb, ba, bc, b1], axis=0)                  # (4, H1) f32
    w1 = W1.astype(bf16)                                                # (3*H1, H1)
    w2 = W2.astype(bf16)                                                # (H1, H2)
    const_h = jnp.concatenate([
        b2,                                                             # (1, H2)
        head["W3"].astype(f32),                                         # (1, H2)
        jnp.broadcast_to(head["b3"].astype(f32), (1, H2)),
    ], axis=0)                                                          # (3, H2)

    # --- batch tiling: >=2 parallel grid steps (v7x dual TC), sublane aligned ---
    if block_b is None:
        block_b = -(-B // 2)
    block_b = _round_up(max(8, min(block_b, 256)), 8)
    block_b = min(block_b, _round_up(B, 8))
    Bp = _round_up(B, block_b)
    pad = Bp - B
    xb = b_gex.astype(f32)
    xc = comp.astype(f32)
    if pad:
        # Padded rows produce garbage (sliced off below); rsqrt(1e-5) keeps them finite.
        xb = jnp.pad(xb, ((0, pad), (0, 0)))
        xc = jnp.pad(xc, ((0, pad), (0, 0)))

    kernel = functools.partial(fused_kernel, inv_sqrt_h=float(1.0 / np.sqrt(H)))
    row = lambda b: (b, 0)
    c2 = lambda b: (0, 0)
    c3 = lambda b: (0, 0, 0)

    out = pl.pallas_call(
        kernel,
        out_shape=jax.ShapeDtypeStruct((Bp, OUT_LANES), f32),
        grid=(Bp // block_b,),
        in_specs=[
            pl.BlockSpec((block_b, G), row),        # raw b_gex rows
            pl.BlockSpec((block_b, G), row),        # comp rows
            pl.BlockSpec((2 * G, H), c2),           # [w_gex; w_comp]
            pl.BlockSpec((H, 2 * G), c2),           # [w_gex^T | w_comp^T]
            pl.BlockSpec((G, G), c2),               # w_ff^T
            pl.BlockSpec((5, G), c2),               # ppi_rowsum / LN / scaling consts
            pl.BlockSpec((3, G, H1), c3),           # proj weights (bf16)
            pl.BlockSpec((4, H1), c2),              # proj biases + b1
            pl.BlockSpec((3 * H1, H1), c2),         # W1 (bf16)
            pl.BlockSpec((H1, H2), c2),             # W2 (bf16)
            pl.BlockSpec((3, H2), c2),              # b2 / W3 row / b3
        ],
        out_specs=pl.BlockSpec((block_b, OUT_LANES), row),
        compiler_params=pltpu.CompilerParams(
            dimension_semantics=("parallel",),
            vmem_limit_bytes=32 * 1024 * 1024),
    )(xb, xc, w_qstack, w_tstack, w_ff_t, const_g, w_proj, b_proj, w1, w2, const_h)
    return out[:B, :1]


# -----------------------------------------------------------------------------
# CCE stand-in (submodule source not provided) — plain-JAX glue
# -----------------------------------------------------------------------------
def cce_placeholder(node_feat, mask, adj_matrix, dist_matrix, dose, time, params):
    # TODO(synk): CCE submodule source was not provided; deterministic
    # masked-mean-pool + linear stand-in (adj_matrix / dist_matrix unused here).
    msum = jnp.maximum(mask.sum(axis=1, keepdims=True), 1.0)
    pooled = (node_feat * mask[:, :, None]).sum(axis=1) / msum              # (B, F)
    comp = jnp.tanh(pooled @ params["cce"]["w"]
                    + dose[:, None] * params["cce"]["v_dose"]
                    + time[:, None] * params["cce"]["v_time"])              # (B, G)
    return comp


@functools.partial(jax.jit, static_argnames=("block_b",))
def csg2a_finetune_forward(b_gex, node_feat, mask, adj_matrix, dist_matrix,
                           dose, time, params, *, block_b=None):
    comp = cce_placeholder(node_feat, mask, adj_matrix, dist_matrix, dose, time, params)
    output = csg2a_finetune_pallas(b_gex, comp, params, block_b=block_b)
    return output, comp


# -----------------------------------------------------------------------------
# Pure-JAX references for correctness checks (f32, eval-mode BN/Dropout)
# -----------------------------------------------------------------------------
def reference_csg2a(scaled_gex, comp, params):
    H = params["w_gex"].shape[1]
    q = scaled_gex[:, :, None] * params["w_gex"] + comp[:, :, None] * params["w_comp"]
    score = jnp.einsum("bgh,bkh->bgk", q, q) / np.sqrt(H)
    weight = score + params["ppi_adj"][None]
    pred = scaled_gex * weight.sum(-1)
    mu = pred.mean(-1, keepdims=True)
    var = ((pred - mu) ** 2).mean(-1, keepdims=True)
    normed = (pred - mu) / jnp.sqrt(var + 1e-5)
    normed = normed * params["ln_gamma"] + params["ln_beta"]
    act = jnp.maximum(normed, 0.0)
    return act @ params["w_ff"].T


def _bn_eval(x, bn, eps=1e-5):
    return (x - bn["mean"]) / jnp.sqrt(bn["var"] + eps) * bn["gamma"] + bn["beta"]


def reference_head(b_gex, pred_gex, comp, params):
    def proj(x, p):
        return jnp.maximum(_bn_eval(x @ p["W"].T + p["b"], p["bn"]), 0.0)
    h = jnp.concatenate([proj(b_gex, params["bgex_proj"]),
                         proj(pred_gex, params["agex_proj"]),
                         proj(comp, params["comp_proj"])], axis=1)
    hd = params["pred_head"]
    h1 = jnp.maximum(_bn_eval(h @ hd["W1"].T + hd["b1"], hd["bn1"]), 0.0)
    h2 = jnp.maximum(_bn_eval(h1 @ hd["W2"].T + hd["b2"], hd["bn2"]), 0.0)
    return h2 @ hd["W3"].T + hd["b3"]


# -----------------------------------------------------------------------------
# Main
# -----------------------------------------------------------------------------
if __name__ == "__main__":
    B, G, H = 16, 128, 32          # batch, gex_dim, hdim
    N, F = 8, 16                   # graph nodes, node feature dim
    H1, H2 = 512, 64               # finetune_hdim1, finetune_hdim2

    key = jax.random.PRNGKey(0)
    ks = iter(jax.random.split(key, 64))

    def lin_init(k, out_f, in_f):
        bound = float(1.0 / np.sqrt(in_f))
        kw, kb = jax.random.split(k)
        return (jax.random.uniform(kw, (out_f, in_f), jnp.float32, -bound, bound),
                jax.random.uniform(kb, (out_f,), jnp.float32, -bound, bound))

    def bn_init(k, n):
        k1, k2, k3, k4 = jax.random.split(k, 4)
        return {"gamma": 1.0 + 0.1 * jax.random.normal(k1, (n,), jnp.float32),
                "beta": 0.1 * jax.random.normal(k2, (n,), jnp.float32),
                "mean": 0.1 * jax.random.normal(k3, (n,), jnp.float32),
                "var": jax.random.uniform(k4, (n,), jnp.float32, 0.5, 1.5)}

    def proj_init(k, in_f, out_f):
        k1, k2 = jax.random.split(k)
        W, b = lin_init(k1, out_f, in_f)
        return {"W": W, "b": b, "bn": bn_init(k2, out_f)}

    W1, b1 = lin_init(next(ks), H1, 3 * H1)
    W2, b2 = lin_init(next(ks), H2, H1)
    W3, b3 = lin_init(next(ks), 1, H2)
    params = {
        "w_gex":   jax.random.normal(next(ks), (G, H), jnp.float32),
        "w_comp":  jax.random.normal(next(ks), (G, H), jnp.float32),
        "ppi_adj": (jax.random.uniform(next(ks), (G, G)) < 0.1).astype(jnp.float32),
        "ln_gamma": 1.0 + 0.1 * jax.random.normal(next(ks), (G,), jnp.float32),
        "ln_beta":  0.1 * jax.random.normal(next(ks), (G,), jnp.float32),
        "w_ff":    jax.random.uniform(next(ks), (G, G), jnp.float32,
                                      -1.0 / np.sqrt(G), 1.0 / np.sqrt(G)),
        "scalar":  jnp.abs(jax.random.normal(next(ks), (1,), jnp.float32)) + 1e-8,
        "scalar_bias": jax.random.normal(next(ks), (1,), jnp.float32),
        "bgex_proj": proj_init(next(ks), G, H1),
        "agex_proj": proj_init(next(ks), G, H1),
        "comp_proj": proj_init(next(ks), G, H1),
        "pred_head": {"W1": W1, "b1": b1, "bn1": bn_init(next(ks), H1),
                      "W2": W2, "b2": b2, "bn2": bn_init(next(ks), H2),
                      "W3": W3, "b3": b3},
        "cce": {"w": jax.random.normal(next(ks), (F, G), jnp.float32) * 0.1,
                "v_dose": jax.random.normal(next(ks), (G,), jnp.float32) * 0.1,
                "v_time": jax.random.normal(next(ks), (G,), jnp.float32) * 0.1},
    }

    b_gex = jax.random.normal(next(ks), (B, G), jnp.float32)
    node_feat = jax.random.normal(next(ks), (B, N, F), jnp.float32)
    mask = (jax.random.uniform(next(ks), (B, N)) < 0.8).astype(jnp.float32)
    adj_matrix = (jax.random.uniform(next(ks), (B, N, N)) < 0.3).astype(jnp.float32)
    dist_matrix = jax.random.uniform(next(ks), (B, N, N), jnp.float32)
    dose = jax.random.uniform(next(ks), (B,), jnp.float32, 0.1, 10.0)
    time_ = jax.random.uniform(next(ks), (B,), jnp.float32, 1.0, 24.0)

    output, comp = csg2a_finetune_forward(b_gex, node_feat, mask, adj_matrix,
                                          dist_matrix, dose, time_, params)
    output = jax.block_until_ready(output)
    comp = jax.block_until_ready(comp)
    assert output.shape == (B, 1) and comp.shape == (B, G)

    # Correctness vs plain-JAX f32 reference (eval-mode BN/Dropout).
    # Tolerance 2e-2 accounts for bf16 MXU operands in the finetune head
    # (CSG2A core / LayerNorm path is kept f32 inside the fused kernel).
    scaled_ref = (b_gex + params["scalar_bias"]) * params["scalar"]
    pred_ref = reference_csg2a(scaled_ref, comp, params)
    out_ref = reference_head(b_gex, pred_ref, comp, params)
    np.testing.assert_allclose(np.asarray(output), np.asarray(out_ref),
                               rtol=2e-2, atol=2e-2)
    print("KERNEL_OK")
</pallas_src>

<mosaic_0001>
module attributes {stable_mosaic.version = 11 : i64} {
  func.func @fused_kernel(%arg0: i32, %arg1: memref<8x128xf32, #tpu.memory_space<vmem>>, %arg2: memref<8x128xf32, #tpu.memory_space<vmem>>, %arg3: memref<256x32xf32, #tpu.memory_space<vmem>>, %arg4: memref<32x256xf32, #tpu.memory_space<vmem>>, %arg5: memref<128x128xf32, #tpu.memory_space<vmem>>, %arg6: memref<5x128xf32, #tpu.memory_space<vmem>>, %arg7: memref<3x128x512xbf16, #tpu.memory_space<vmem>>, %arg8: memref<4x512xf32, #tpu.memory_space<vmem>>, %arg9: memref<1536x512xbf16, #tpu.memory_space<vmem>>, %arg10: memref<512x64xbf16, #tpu.memory_space<vmem>>, %arg11: memref<3x64xf32, #tpu.memory_space<vmem>>, %arg12: memref<8x128xf32, #tpu.memory_space<vmem>>) attributes {dimension_semantics = [#tpu.dimension_semantics<parallel>], iteration_bounds = array<i64: 2>, scalar_prefetch = 0 : i64, scratch_operands = 0 : i64, tpu.core_type = #tpu.core_type<tc>, window_params = [{transform_indices = @transform_0, window_bounds = array<i64: 8, 128>}, {transform_indices = @transform_1, window_bounds = array<i64: 8, 128>}, {pipeline_mode = #tpu.pipeline_mode<synchronous>, transform_indices = @transform_2, window_bounds = array<i64: 256, 32>}, {pipeline_mode = #tpu.pipeline_mode<synchronous>, transform_indices = @transform_3, window_bounds = array<i64: 32, 256>}, {pipeline_mode = #tpu.pipeline_mode<synchronous>, transform_indices = @transform_4, window_bounds = array<i64: 128, 128>}, {pipeline_mode = #tpu.pipeline_mode<synchronous>, transform_indices = @transform_5, window_bounds = array<i64: 5, 128>}, {pipeline_mode = #tpu.pipeline_mode<synchronous>, transform_indices = @transform_6, window_bounds = array<i64: 3, 128, 512>}, {pipeline_mode = #tpu.pipeline_mode<synchronous>, transform_indices = @transform_7, window_bounds = array<i64: 4, 512>}, {pipeline_mode = #tpu.pipeline_mode<synchronous>, transform_indices = @transform_8, window_bounds = array<i64: 1536, 512>}, {pipeline_mode = #tpu.pipeline_mode<synchronous>, transform_indices = @transform_9, window_bounds = array<i64: 512, 64>}, {pipeline_mode = #tpu.pipeline_mode<synchronous>, transform_indices = @transform_10, window_bounds = array<i64: 3, 64>}, {transform_indices = @transform_11, window_bounds = array<i64: 8, 128>}]} {
    %c0 = arith.constant 0 : index
    %c0_0 = arith.constant 0 : index
    %0 = vector.load %arg1[%c0, %c0_0] : memref<8x128xf32, #tpu.memory_space<vmem>>, vector<8x128xf32>
    %c0_1 = arith.constant 0 : index
    %c0_2 = arith.constant 0 : index
    %1 = vector.load %arg2[%c0_1, %c0_2] : memref<8x128xf32, #tpu.memory_space<vmem>>, vector<8x128xf32>
    %c0_3 = arith.constant 0 : index
    %c0_4 = arith.constant 0 : index
    %2 = vector.load %arg6[%c0_3, %c0_4] : memref<5x128xf32, #tpu.memory_space<vmem>>, vector<1x128xf32>
    %c1 = arith.constant 1 : index
    %c0_5 = arith.constant 0 : index
    %3 = vector.load %arg6[%c1, %c0_5] : memref<5x128xf32, #tpu.memory_space<vmem>>, vector<1x128xf32>
    %c2 = arith.constant 2 : index
    %c0_6 = arith.constant 0 : index
    %4 = vector.load %arg6[%c2, %c0_6] : memref<5x128xf32, #tpu.memory_space<vmem>>, vector<1x128xf32>
    %c3 = arith.constant 3 : index
    %c0_7 = arith.constant 0 : index
    %5 = vector.load %arg6[%c3, %c0_7] : memref<5x128xf32, #tpu.memory_space<vmem>>, vector<1x128xf32>
    %c4 = arith.constant 4 : index
    %c0_8 = arith.constant 0 : index
    %6 = vector.load %arg6[%c4, %c0_8] : memref<5x128xf32, #tpu.memory_space<vmem>>, vector<1x128xf32>
    %7 = vector.broadcast %5 : vector<1x128xf32> to vector<8x128xf32>
    %8 = arith.mulf %0, %7 : vector<8x128xf32>
    %9 = vector.broadcast %6 : vector<1x128xf32> to vector<8x128xf32>
    %10 = arith.addf %8, %9 : vector<8x128xf32>
    %11 = tpu.concatenate %10, %1 in 1 : vector<8x128xf32>, vector<8x128xf32> -> vector<8x256xf32>
    %c0_9 = arith.constant 0 : index
    %c0_10 = arith.constant 0 : index
    %12 = vector.load %arg3[%c0_9, %c0_10] : memref<256x32xf32, #tpu.memory_space<vmem>>, vector<256x32xf32>
    %cst = arith.constant dense<0.000000e+00> : vector<8x32xf32>
    %13 = tpu.matmul %11, %12, %cst {dimension_numbers = #tpu.dot_dimension_numbers<[1], [0], [0], [1], [0, 0, 1, 1], [], []>} : vector<8x256xf32>, vector<256x32xf32>, vector<8x32xf32> -> vector<8x32xf32>
    %c0_11 = arith.constant 0 : index
    %c0_12 = arith.constant 0 : index
    %14 = vector.load %arg4[%c0_11, %c0_12] : memref<32x256xf32, #tpu.memory_space<vmem>>, vector<32x256xf32>
    %cst_13 = arith.constant dense<0.000000e+00> : vector<8x256xf32>
    %15 = tpu.matmul %13, %14, %cst_13 {dimension_numbers = #tpu.dot_dimension_numbers<[1], [0], [0], [1], [0, 0, 1, 1], [], []>} : vector<8x32xf32>, vector<32x256xf32>, vector<8x256xf32> -> vector<8x256xf32>
    %16 = vector.extract_strided_slice %15 {offsets = [0, 0], sizes = [8, 128], strides = [1, 1]} : vector<8x256xf32> to vector<8x128xf32>
    %17 = vector.extract_strided_slice %15 {offsets = [0, 128], sizes = [8, 128], strides = [1, 1]} : vector<8x256xf32> to vector<8x128xf32>
    %18 = arith.mulf %10, %16 : vector<8x128xf32>
    %19 = arith.mulf %1, %17 : vector<8x128xf32>
    %20 = arith.addf %18, %19 : vector<8x128xf32>
    %cst_14 = arith.constant 0.176776692 : f32
    %21 = vector.broadcast %cst_14 : f32 to vector<8x128xf32>
    %22 = arith.mulf %20, %21 : vector<8x128xf32>
    %23 = vector.broadcast %2 : vector<1x128xf32> to vector<8x128xf32>
    %24 = arith.addf %22, %23 : vector<8x128xf32>
    %25 = arith.mulf %10, %24 : vector<8x128xf32>
    %cst_15 = arith.constant dense<0.000000e+00> : vector<8xf32>
    %26 = vector.multi_reduction <add>, %25, %cst_15 [1] : vector<8x128xf32> to vector<8xf32>
    %27 = vector.shape_cast %26 : vector<8xf32> to vector<8x1xf32>
    %cst_16 = arith.constant 1.280000e+02 : f32
    %28 = vector.broadcast %cst_16 : f32 to vector<8x1xf32>
    %29 = arith.divf %27, %28 : vector<8x1xf32>
    %30 = vector.broadcast %29 : vector<8x1xf32> to vector<8x128xf32>
    %31 = arith.subf %25, %30 : vector<8x128xf32>
    %32 = arith.mulf %31, %31 : vector<8x128xf32>
    %cst_17 = arith.constant dense<0.000000e+00> : vector<8xf32>
    %33 = vector.multi_reduction <add>, %32, %cst_17 [1] : vector<8x128xf32> to vector<8xf32>
    %34 = vector.shape_cast %33 : vector<8xf32> to vector<8x1xf32>
    %cst_18 = arith.constant 1.280000e+02 : f32
    %35 = vector.broadcast %cst_18 : f32 to vector<8x1xf32>
    %36 = arith.divf %34, %35 : vector<8x1xf32>
    %37 = vector.broadcast %29 : vector<8x1xf32> to vector<8x128xf32>
    %38 = arith.subf %25, %37 : vector<8x128xf32>
    %cst_19 = arith.constant 9.99999974E-6 : f32
    %39 = vector.broadcast %cst_19 : f32 to vector<8x1xf32>
    %40 = arith.addf %36, %39 : vector<8x1xf32>
    %41 = math.rsqrt %40 : vector<8x1xf32>
    %42 = vector.broadcast %41 : vector<8x1xf32> to vector<8x128xf32>
    %43 = arith.mulf %38, %42 : vector<8x128xf32>
    %44 = vector.broadcast %3 : vector<1x128xf32> to vector<8x128xf32>
    %45 = arith.mulf %43, %44 : vector<8x128xf32>
    %46 = vector.broadcast %4 : vector<1x128xf32> to vector<8x128xf32>
    %47 = arith.addf %45, %46 : vector<8x128xf32>
    %cst_20 = arith.constant 0.000000e+00 : f32
    %48 = vector.broadcast %cst_20 : f32 to vector<8x128xf32>
    %49 = arith.maximumf %47, %48 : vector<8x128xf32>
    %c0_21 = arith.constant 0 : index
    %c0_22 = arith.constant 0 : index
    %50 = vector.load %arg5[%c0_21, %c0_22] : memref<128x128xf32, #tpu.memory_space<vmem>>, vector<128x128xf32>
    %cst_23 = arith.constant dense<0.000000e+00> : vector<8x128xf32>
    %51 = tpu.matmul %49, %50, %cst_23 {dimension_numbers = #tpu.dot_dimension_numbers<[1], [0], [0], [1], [0, 0, 1, 1], [], []>} : vector<8x128xf32>, vector<128x128xf32>, vector<8x128xf32> -> vector<8x128xf32>
    %52 = arith.truncf %0 : vector<8x128xf32> to vector<8x128xbf16>
    %c0_24 = arith.constant 0 : index
    %c0_25 = arith.constant 0 : index
    %c0_26 = arith.constant 0 : index
    %53 = vector.load %arg7[%c0_24, %c0_25, %c0_26] : memref<3x128x512xbf16, #tpu.memory_space<vmem>>, vector<1x128x512xbf16>
    %54 = vector.shape_cast %53 : vector<1x128x512xbf16> to vector<128x512xbf16>
    %cst_27 = arith.constant dense<0.000000e+00> : vector<8x512xf32>
    %55 = tpu.matmul %52, %54, %cst_27 {dimension_numbers = #tpu.dot_dimension_numbers<[1], [0], [0], [1], [0, 0, 1, 1], [], []>} : vector<8x128xbf16>, vector<128x512xbf16>, vector<8x512xf32> -> vector<8x512xf32>
    %c0_28 = arith.constant 0 : index
    %c0_29 = arith.constant 0 : index
    %56 = vector.load %arg8[%c0_28, %c0_29] : memref<4x512xf32, #tpu.memory_space<vmem>>, vector<1x512xf32>
    %57 = vector.broadcast %56 : vector<1x512xf32> to vector<8x512xf32>
    %58 = arith.addf %55, %57 : vector<8x512xf32>
    %cst_30 = arith.constant 0.000000e+00 : f32
    %59 = vector.broadcast %cst_30 : f32 to vector<8x512xf32>
    %60 = arith.maximumf %58, %59 : vector<8x512xf32>
    %61 = arith.truncf %51 : vector<8x128xf32> to vector<8x128xbf16>
    %c1_31 = arith.constant 1 : index
    %c0_32 = arith.constant 0 : index
    %c0_33 = arith.constant 0 : index
    %62 = vector.load %arg7[%c1_31, %c0_32, %c0_33] : memref<3x128x512xbf16, #tpu.memory_space<vmem>>, vector<1x128x512xbf16>
    %63 = vector.shape_cast %62 : vector<1x128x512xbf16> to vector<128x512xbf16>
    %cst_34 = arith.constant dense<0.000000e+00> : vector<8x512xf32>
    %64 = tpu.matmul %61, %63, %cst_34 {dimension_numbers = #tpu.dot_dimension_numbers<[1], [0], [0], [1], [0, 0, 1, 1], [], []>} : vector<8x128xbf16>, vector<128x512xbf16>, vector<8x512xf32> -> vector<8x512xf32>
    %c1_35 = arith.constant 1 : index
    %c0_36 = arith.constant 0 : index
    %65 = vector.load %arg8[%c1_35, %c0_36] : memref<4x512xf32, #tpu.memory_space<vmem>>, vector<1x512xf32>
    %66 = vector.broadcast %65 : vector<1x512xf32> to vector<8x512xf32>
    %67 = arith.addf %64, %66 : vector<8x512xf32>
    %cst_37 = arith.constant 0.000000e+00 : f32
    %68 = vector.broadcast %cst_37 : f32 to vector<8x512xf32>
    %69 = arith.maximumf %67, %68 : vector<8x512xf32>
    %70 = arith.truncf %1 : vector<8x128xf32> to vector<8x128xbf16>
    %c2_38 = arith.constant 2 : index
    %c0_39 = arith.constant 0 : index
    %c0_40 = arith.constant 0 : index
    %71 = vector.load %arg7[%c2_38, %c0_39, %c0_40] : memref<3x128x512xbf16, #tpu.memory_space<vmem>>, vector<1x128x512xbf16>
    %72 = vector.shape_cast %71 : vector<1x128x512xbf16> to vector<128x512xbf16>
    %cst_41 = arith.constant dense<0.000000e+00> : vector<8x512xf32>
    %73 = tpu.matmul %70, %72, %cst_41 {dimension_numbers = #tpu.dot_dimension_numbers<[1], [0], [0], [1], [0, 0, 1, 1], [], []>} : vector<8x128xbf16>, vector<128x512xbf16>, vector<8x512xf32> -> vector<8x512xf32>
    %c2_42 = arith.constant 2 : index
    %c0_43 = arith.constant 0 : index
    %74 = vector.load %arg8[%c2_42, %c0_43] : memref<4x512xf32, #tpu.memory_space<vmem>>, vector<1x512xf32>
    %75 = vector.broadcast %74 : vector<1x512xf32> to vector<8x512xf32>
    %76 = arith.addf %73, %75 : vector<8x512xf32>
    %cst_44 = arith.constant 0.000000e+00 : f32
    %77 = vector.broadcast %cst_44 : f32 to vector<8x512xf32>
    %78 = arith.maximumf %76, %77 : vector<8x512xf32>
    %79 = tpu.concatenate %60, %69, %78 in 1 : vector<8x512xf32>, vector<8x512xf32>, vector<8x512xf32> -> vector<8x1536xf32>
    %80 = arith.truncf %79 : vector<8x1536xf32> to vector<8x1536xbf16>
    %c0_45 = arith.constant 0 : index
    %c0_46 = arith.constant 0 : index
    %81 = vector.load %arg9[%c0_45, %c0_46] : memref<1536x512xbf16, #tpu.memory_space<vmem>>, vector<1536x512xbf16>
    %cst_47 = arith.constant dense<0.000000e+00> : vector<8x512xf32>
    %82 = tpu.matmul %80, %81, %cst_47 {dimension_numbers = #tpu.dot_dimension_numbers<[1], [0], [0], [1], [0, 0, 1, 1], [], []>} : vector<8x1536xbf16>, vector<1536x512xbf16>, vector<8x512xf32> -> vector<8x512xf32>
    %c3_48 = arith.constant 3 : index
    %c0_49 = arith.constant 0 : index
    %83 = vector.load %arg8[%c3_48, %c0_49] : memref<4x512xf32, #tpu.memory_space<vmem>>, vector<1x512xf32>
    %84 = vector.broadcast %83 : vector<1x512xf32> to vector<8x512xf32>
    %85 = arith.addf %82, %84 : vector<8x512xf32>
    %cst_50 = arith.constant 0.000000e+00 : f32
    %86 = vector.broadcast %cst_50 : f32 to vector<8x512xf32>
    %87 = arith.maximumf %85, %86 : vector<8x512xf32>
    %88 = arith.truncf %87 : vector<8x512xf32> to vector<8x512xbf16>
    %c0_51 = arith.constant 0 : index
    %c0_52 = arith.constant 0 : index
    %89 = vector.load %arg10[%c0_51, %c0_52] : memref<512x64xbf16, #tpu.memory_space<vmem>>, vector<512x64xbf16>
    %cst_53 = arith.constant dense<0.000000e+00> : vector<8x64xf32>
    %90 = tpu.matmul %88, %89, %cst_53 {dimension_numbers = #tpu.dot_dimension_numbers<[1], [0], [0], [1], [0, 0, 1, 1], [], []>} : vector<8x512xbf16>, vector<512x64xbf16>, vector<8x64xf32> -> vector<8x64xf32>
    %c0_54 = arith.constant 0 : index
    %c0_55 = arith.constant 0 : index
    %91 = vector.load %arg11[%c0_54, %c0_55] : memref<3x64xf32, #tpu.memory_space<vmem>>, vector<1x64xf32>
    %92 = vector.broadcast %91 : vector<1x64xf32> to vector<8x64xf32>
    %93 = arith.addf %90, %92 : vector<8x64xf32>
    %cst_56 = arith.constant 0.000000e+00 : f32
    %94 = vector.broadcast %cst_56 : f32 to vector<8x64xf32>
    %95 = arith.maximumf %93, %94 : vector<8x64xf32>
    %c1_57 = arith.constant 1 : index
    %c0_58 = arith.constant 0 : index
    %96 = vector.load %arg11[%c1_57, %c0_58] : memref<3x64xf32, #tpu.memory_space<vmem>>, vector<1x64xf32>
    %97 = vector.broadcast %96 : vector<1x64xf32> to vector<8x64xf32>
    %98 = arith.mulf %95, %97 : vector<8x64xf32>
    %cst_59 = arith.constant dense<0.000000e+00> : vector<8xf32>
    %99 = vector.multi_reduction <add>, %98, %cst_59 [1] : vector<8x64xf32> to vector<8xf32>
    %100 = vector.shape_cast %99 : vector<8xf32> to vector<8x1xf32>
    %c2_60 = arith.constant 2 : index
    %c0_61 = arith.constant 0 : index
    %101 = vector.load %arg11[%c2_60, %c0_61] : memref<3x64xf32, #tpu.memory_space<vmem>>, vector<1x1xf32>
    %102 = vector.broadcast %101 : vector<1x1xf32> to vector<8x1xf32>
    %103 = arith.addf %100, %102 : vector<8x1xf32>
    %104 = vector.shape_cast %103 : vector<8x1xf32> to vector<8x1xf32>
    %105 = vector.broadcast %104 : vector<8x1xf32> to vector<8x128xf32>
    %c0_62 = arith.constant 0 : index
    %c0_63 = arith.constant 0 : index
    %106 = vector.load %arg12[%c0_62, %c0_63] : memref<8x128xf32, #tpu.memory_space<vmem>>, vector<8x128xf32>
    tpu.vector_store %arg12[%c0_62, %c0_63], %105 {strides = array<i32>} : memref<8x128xf32, #tpu.memory_space<vmem>>, vector<8x128xf32>,
    return
  }
  func.func @transform_0(%arg0: i32) -> (i32, i32) {
    %c0_i32 = arith.constant 0 : i32
    %c0_i32_0 = arith.constant 0 : i32
    return %arg0, %c0_i32 : i32, i32
  }
  func.func @transform_1(%arg0: i32) -> (i32, i32) {
    %c0_i32 = arith.constant 0 : i32
    %c0_i32_0 = arith.constant 0 : i32
    return %arg0, %c0_i32 : i32, i32
  }
  func.func @transform_2(%arg0: i32) -> (i32, i32) {
    %c0_i32 = arith.constant 0 : i32
    %c0_i32_0 = arith.constant 0 : i32
    %c0_i32_1 = arith.constant 0 : i32
    return %c0_i32, %c0_i32_0 : i32, i32
  }
  func.func @transform_3(%arg0: i32) -> (i32, i32) {
    %c0_i32 = arith.constant 0 : i32
    %c0_i32_0 = arith.constant 0 : i32
    %c0_i32_1 = arith.constant 0 : i32
    return %c0_i32, %c0_i32_0 : i32, i32
  }
  func.func @transform_4(%arg0: i32) -> (i32, i32) {
    %c0_i32 = arith.constant 0 : i32
    %c0_i32_0 = arith.constant 0 : i32
    %c0_i32_1 = arith.constant 0 : i32
    return %c0_i32, %c0_i32_0 : i32, i32
  }
  func.func @transform_5(%arg0: i32) -> (i32, i32) {
    %c0_i32 = arith.constant 0 : i32
    %c0_i32_0 = arith.constant 0 : i32
    %c0_i32_1 = arith.constant 0 : i32
    return %c0_i32, %c0_i32_0 : i32, i32
  }
  func.func @transform_6(%arg0: i32) -> (i32, i32, i32) {
    %c0_i32 = arith.constant 0 : i32
    %c0_i32_0 = arith.constant 0 : i32
    %c0_i32_1 = arith.constant 0 : i32
    %c0_i32_2 = arith.constant 0 : i32
    return %c0_i32, %c0_i32_0, %c0_i32_1 : i32, i32, i32
  }
  func.func @transform_7(%arg0: i32) -> (i32, i32) {
    %c0_i32 = arith.constant 0 : i32
    %c0_i32_0 = arith.constant 0 : i32
    %c0_i32_1 = arith.constant 0 : i32
    return %c0_i32, %c0_i32_0 : i32, i32
  }
  func.func @transform_8(%arg0: i32) -> (i32, i32) {
    %c0_i32 = arith.constant 0 : i32
    %c0_i32_0 = arith.constant 0 : i32
    %c0_i32_1 = arith.constant 0 : i32
    return %c0_i32, %c0_i32_0 : i32, i32
  }
  func.func @transform_9(%arg0: i32) -> (i32, i32) {
    %c0_i32 = arith.constant 0 : i32
    %c0_i32_0 = arith.constant 0 : i32
    %c0_i32_1 = arith.constant 0 : i32
    return %c0_i32, %c0_i32_0 : i32, i32
  }
  func.func @transform_10(%arg0: i32) -> (i32, i32) {
    %c0_i32 = arith.constant 0 : i32
    %c0_i32_0 = arith.constant 0 : i32
    %c0_i32_1 = arith.constant 0 : i32
    return %c0_i32, %c0_i32_0 : i32, i32
  }
  func.func @transform_11(%arg0: i32) -> (i32, i32) {
    %c0_i32 = arith.constant 0 : i32
    %c0_i32_0 = arith.constant 0 : i32
    return %arg0, %c0_i32 : i32, i32
  }
}

</mosaic_0001>

<bundles_post_ra>
// kernel: csg2a_finetune_forward.1
= control target key start
LH: loop header
LB: loop body
LE: loop exit
PB: predicated region body
PF: predicated region fallthrough
CT: control target
= control target key end

     0   :  { %s6465_s17 = smov 0   ;;  %s8404_s0 = inlined_call_operand.vmem [shape: f32[16,128], index: 0, kind: input, shape index: {}]   ;;  %s8405_s1 = inlined_call_operand.vmem [shape: f32[16,128], index: 1, kind: input, shape index: {}]   ;;  %s8406_s2 = inlined_call_operand.vmem [shape: f32[256,32], index: 2, kind: input, shape index: {}]   ;;  %s8407_s3 = inlined_call_operand.vmem [shape: f32[32,256], index: 3, kind: input, shape index: {}]   ;;  %s8408_s4 = inlined_call_operand.vmem [shape: f32[128,128], index: 4, kind: input, shape index: {}]   ;;  %s8409_s5 = inlined_call_operand.vmem [shape: f32[5,128], index: 5, kind: input, shape index: {}]   ;;  %s8410_s6 = inlined_call_operand.vmem [shape: bf16[3,128,512], index: 6, kind: input, shape index: {}]   ;;  %s8411_s7 = inlined_call_operand.vmem [shape: f32[4,512], index: 7, kind: input, shape index: {}]   ;;  %s8412_s8 = inlined_call_operand.vmem [shape: bf16[1536,512], index: 8, kind: input, shape index: {}]   ;;  %s8413_s9 = inlined_call_operand.vmem [shape: bf16[512,64], index: 9, kind: input, shape index: {}]   ;;  %s8414_s10 = inlined_call_operand.vmem [shape: f32[3,64], index: 10, kind: input, shape index: {}]   ;;  %s8415_s11 = inlined_call_operand.vmem [shape: f32[16,128], index: 11, kind: output, shape index: {}]  }
   0x1 LB: > { %s4896_s18 = sadd.s32 4294967295, %s6400_s17   ;;  %p4900_p0 = scmp.ge.s32.totalorder %s6400_s17, 1  ;;  %s6400_s17 = sphi %s6465_s17, %s21_s17  }
   0x2   : > { %p345_p1 = scmp.lt.s32.totalorder %s6400_s17, 3 }
   0x4   : > { %p346_p2 = pnand %p4900_p0, %p345_p1 }
   0x5   : > { %p387_p3 = scmp.lt.s32.totalorder (!%p346_p2), %s4896_s18, 1 }
   0x6   : > { %349 = sbr.rel (%p346_p2) target bundleno = 2080 (0x820), region = 64 }
   0xb   : > { %v448_v0 = vld [vmem:[%s8406_s2 + $0xf8] sm:$0xff]  ;;  %v447_v2 = vld [vmem:[%s8406_s2 + $0xf0] sm:$0xff]  ;;  %v446_v4 = vld [vmem:[%s8406_s2 + $0xe8] sm:$0xff]  ;;  %s8417_s18 = smov (!%p387_p3, %s4896_s18), 1  ;;  %v6402_v46 = vmov 0.0   ;;  %vm527_vm0 = vcmask 261120  }
   0xc   : > { %v432_v1 = vld [vmem:[%s8406_s2 + $0x78] sm:$0xff]  ;;  %5494 = vmatprep.subr.mxu0 %v448_v0  ;;  %v431_v3 = vld [vmem:[%s8406_s2 + $0x70] sm:$0xff]  ;;  %v430_v5 = vld [vmem:[%s8406_s2 + $0x68] sm:$0xff]  ;;  %s6503_s22 = sshll.u32 %s8417_s18, 3  ;;  %595 = vmatprep.mubr.f32.mxu1 %v6402_v46  ;;  %vm6403_vm1 = vmmov 0   ;;  %vm4815_vm2 = vcmask 523264  }
   0xd   : > { %5495 = vmatpush3.msra.mxu0 %v432_v1  ;;  %v445_v6 = vld [vmem:[%s8406_s2 + $0xe0] sm:$0xff]  ;;  %v444_v8 = vld [vmem:[%s8406_s2 + $0xd8] sm:$0xff]  ;;  %v443_v10 = vld [vmem:[%s8406_s2 + $0xd0] sm:$0xff]  ;;  %s6512_s27 = scalar_lea.vmem %s8405_s1, %s6503_s22  ;;  %s6561_s25 = scalar_lea.vmem %s8404_s0, %s6503_s22 }
   0xe   : > { %5496 = vmatprep.subr.mxu0 %v447_v2  ;;  %v429_v7 = vld [vmem:[%s8406_s2 + $0x60] sm:$0xff]  ;;  %v428_v9 = vld [vmem:[%s8406_s2 + $0x58] sm:$0xff]  ;;  %v427_v11 = vld [vmem:[%s8406_s2 + $0x50] sm:$0xff]  ;;  %s398_s23 = scalar_lea.vmem %s8415_s11, %s6503_s22 }
   0xf   : > { %5497 = vmatpush3.msra.mxu0 %v431_v3  ;;  %v442_v12 = vld [vmem:[%s8406_s2 + $0xc8] sm:$0xff]  ;;  %v441_v14 = vld [vmem:[%s8406_s2 + $0xc0] sm:$0xff]  ;;  %v440_v17 = vld [vmem:[%s8406_s2 + $0xb8] sm:$0xff] }
  0x10   : > { %5498 = vmatprep.subr.mxu0 %v446_v4  ;;  %v426_v13 = vld [vmem:[%s8406_s2 + $0x48] sm:$0xff]  ;;  %v425_v15 = vld [vmem:[%s8406_s2 + $0x40] sm:$0xff]  ;;  %v526_v18 = vld [vmem:[%s8407_s3 + $0x38] sm:$0xff] }
  0x11   : > { %5499 = vmatpush3.msra.mxu0 %v430_v5  ;;  %v401_v16 = vld [vmem:[%s6512_s27] sm:$0xff]  ;;  %v525_v19 = vld [vmem:[%s8407_s3 + $0x30] sm:$0xff]  ;;  %v524_v20 = vld [vmem:[%s8407_s3 + $0x28] sm:$0xff]  ;;  %555 = vmatprep.subr.mxu1 %v526_v18 }
  0x12   : > { %5500 = vmatprep.subr.mxu0 %v445_v6  ;;  %513 = vmatprep.mubr.f32.mxu0 %v401_v16  ;;  %v424_v21 = vld [vmem:[%s8406_s2 + $0x38] sm:$0xff]  ;;  %v439_v22 = vld [vmem:[%s8406_s2 + $0xb0] sm:$0xff]  ;;  %v438_v24 = vld [vmem:[%s8406_s2 + $0xa8] sm:$0xff] }
  0x13   : > { %5501 = vmatpush3.msra.mxu0 %v429_v7  ;;  %556 = vmatpush1.msra.mxu1 %v525_v19  ;;  %v423_v23 = vld [vmem:[%s8406_s2 + $0x30] sm:$0xff]  ;;  %v422_v25 = vld [vmem:[%s8406_s2 + $0x28] sm:$0xff]  ;;  %v437_v26 = vld [vmem:[%s8406_s2 + $0xa0] sm:$0xff] }
  0x14   : > { %5502 = vmatprep.subr.mxu0 %v444_v8  ;;  %557 = vmatprep.subr.mxu1 %v524_v20  ;;  %v421_v27 = vld [vmem:[%s8406_s2 + $0x20] sm:$0xff]  ;;  %v436_v28 = vld [vmem:[%s8406_s2 + $0x98] sm:$0xff]  ;;  %v435_v32 = vld [vmem:[%s8406_s2 + $0x90] sm:$0xff] }
  0x15   : > { %5503 = vmatpush3.msra.mxu0 %v428_v9  ;;  %v400_v29 = vld [vmem:[%s6561_s25] sm:$0xff]  ;;  %v420_v31 = vld [vmem:[%s8406_s2 + $0x18] sm:$0xff]  ;;  %v419_v33 = vld [vmem:[%s8406_s2 + $0x10] sm:$0xff] }
  0x16   : > { %5504 = vmatprep.subr.mxu0 %v443_v10  ;;  %v4904_v30 = vld [vmem:[%s8409_s5 + $0x3] ss:$0 sm:$0xff]  ;;  %v434_v34 = vld [vmem:[%s8406_s2 + $0x88] sm:$0xff]  ;;  %v4905_v35 = vld [vmem:[%s8409_s5 + $0x4] ss:$0 sm:$0xff] }
  0x17   : > { %5505 = vmatpush3.msra.mxu0 %v427_v11  ;;  %v418_v36 = vld [vmem:[%s8406_s2 + $0x8] sm:$0xff]  ;;  %v411_v37 = vmul.f32 %v4904_v30, %v400_v29  ;;  %v433_v38 = vld [vmem:[%s8406_s2 + $0x80] sm:$0xff]  ;;  %v522_v42 = vld [vmem:[%s8407_s3 + $0x18] sm:$0xff] }
  0x18   : > { %5506 = vmatprep.subr.mxu0 %v442_v12  ;;  %v417_v39 = vld [vmem:[%s8406_s2] sm:$0xff]  ;;  %v521_v43 = vld [vmem:[%s8407_s3 + $0x10] sm:$0xff]  ;;  %v520_v44 = vld [vmem:[%s8407_s3 + $0x8] sm:$0xff] }
  0x19   : > { %5507 = vmatpush3.msra.mxu0 %v426_v13  ;;  %v416_v40 = vadd.f32 %v4905_v35, %v411_v37  ;;  %v523_v41 = vld [vmem:[%s8407_s3 + $0x20] sm:$0xff]  ;;  %v650_v60 = vld [vmem:[%s8408_s4 + $0x78] sm:$0xff]  ;;  %v649_v61 = vld [vmem:[%s8408_s4 + $0x70] sm:$0xff] }
  0x1a   : > { %5508 = vmatprep.subr.mxu0 %v441_v14  ;;  %558 = vmatpush1.msra.mxu1 %v523_v41  ;;  %v519_v45 = vld [vmem:[%s8407_s3] sm:$0xff]  ;;  %v648_v62 = vld [vmem:[%s8408_s4 + $0x68] sm:$0xff]  ;;  %v646_v4 = vld [vmem:[%s8408_s4 + $0x58] sm:$0xff] }
  0x1b   : > { %5509 = vmatpush3.msra.mxu0 %v425_v15  ;;  %559 = vmatprep.subr.mxu1 %v522_v42  ;;  %v6618_v53 = vld [vmem:[%s6512_s27] sm:$0xff]  ;;  %v645_v5 = vld [vmem:[%s8408_s4 + $0x50] sm:$0xff]  ;;  %v644_v6 = vld [vmem:[%s8408_s4 + $0x48] sm:$0xff] }
  0x1c   : > { %5510 = vmatprep.subr.mxu0 %v440_v17  ;;  %560 = vmatpush1.msra.mxu1 %v521_v43  ;;  %v4907_v56 = vld [vmem:[%s8409_s5] ss:$0 sm:$0xff]  ;;  %v642_v8 = vld [vmem:[%s8408_s4 + $0x38] sm:$0xff]  ;;  %v641_v9 = vld [vmem:[%s8408_s4 + $0x30] sm:$0xff] }
  0x1d   : > { %5511 = vmatpush3.msra.mxu0 %v424_v21  ;;  %561 = vmatprep.subr.mxu1 %v520_v44  ;;  %v647_v3 = vld [vmem:[%s8408_s4 + $0x60] sm:$0xff]  ;;  %v640_v10 = vld [vmem:[%s8408_s4 + $0x28] sm:$0xff]  ;;  %v638_v12 = vld [vmem:[%s8408_s4 + $0x18] sm:$0xff] }
  0x1e   : > { %5512 = vmatprep.subr.mxu0 %v439_v22  ;;  %562 = vmatpush1.msra.mxu1 %v519_v45  ;;  %v643_v7 = vld [vmem:[%s8408_s4 + $0x40] sm:$0xff]  ;;  %v637_v13 = vld [vmem:[%s8408_s4 + $0x10] sm:$0xff]  ;;  %v636_v14 = vld [vmem:[%s8408_s4 + $0x8] sm:$0xff] }
  0x1f   : > { %5513 = vmatpush3.msra.mxu0 %v423_v23  ;;  %5590 = vmatprep.subr.mxu1 %v6402_v46  ;;  %v639_v11 = vld [vmem:[%s8408_s4 + $0x20] sm:$0xff]  ;;  %v5643_v18 = vld [vmem:[%s8410_s6 + $0xec] ss:$16 sps:$4 sm:$0xff]  }
  0x20   : > { %5514 = vmatprep.subr.mxu0 %v438_v24  ;;  %v635_v15 = vld [vmem:[%s8408_s4] sm:$0xff] }
  0x21   : > { %5515 = vmatpush3.msra.mxu0 %v422_v25  ;;  %v5638_v16 = vld [vmem:[%s8410_s6 + $0xe0] ss:$16 sps:$4 sm:$0xff]   ;;  %v5640_v17 = vld [vmem:[%s8410_s6 + $0xe4] ss:$16 sps:$4 sm:$0xff]  }
  0x22   : > { %5516 = vmatprep.subr.mxu0 %v437_v26  ;;  %v5646_v19 = vld [vmem:[%s8410_s6 + $0xc4] ss:$16 sps:$4 sm:$0xff]   ;;  %v5644_v20 = vld [vmem:[%s8410_s6 + $0xc0] ss:$16 sps:$4 sm:$0xff]  }
  0x23   : > { %5517 = vmatpush3.msra.mxu0 %v421_v27  ;;  %v5652_v21 = vld [vmem:[%s8410_s6 + $0xa4] ss:$16 sps:$4 sm:$0xff]   ;;  %v5650_v22 = vld [vmem:[%s8410_s6 + $0xa0] ss:$16 sps:$4 sm:$0xff]  }
  0x24   : > { %5518 = vmatprep.subr.mxu0 %v436_v28  ;;  %v5658_v23 = vld [vmem:[%s8410_s6 + $0x84] ss:$16 sps:$4 sm:$0xff]   ;;  %v5656_v24 = vld [vmem:[%s8410_s6 + $0x80] ss:$16 sps:$4 sm:$0xff]  }
  0x25   : > { %5519 = vmatpush3.msra.mxu0 %v420_v31  ;;  %v5664_v25 = vld [vmem:[%s8410_s6 + $0x64] ss:$16 sps:$4 sm:$0xff]   ;;  %v5662_v26 = vld [vmem:[%s8410_s6 + $0x60] ss:$16 sps:$4 sm:$0xff]  }
  0x26   : > { %5520 = vmatprep.subr.mxu0 %v435_v32  ;;  %v5670_v27 = vld [vmem:[%s8410_s6 + $0x44] ss:$16 sps:$4 sm:$0xff]   ;;  %v5668_v28 = vld [vmem:[%s8410_s6 + $0x40] ss:$16 sps:$4 sm:$0xff]  }
  0x27   : > { %5521 = vmatpush3.msra.mxu0 %v419_v33  ;;  %v5676_v29 = vld [vmem:[%s8410_s6 + $0x24] ss:$16 sps:$4 sm:$0xff]   ;;  %v5674_v30 = vld [vmem:[%s8410_s6 + $0x20] ss:$16 sps:$4 sm:$0xff]   ;;  %v6404_v33 = vmov 0  }
  0x28   : > { %5522 = vmatprep.subr.mxu0 %v434_v34  ;;  %v5682_v31 = vld [vmem:[%s8410_s6 + $0x4] ss:$16 sps:$4 sm:$0xff]   ;;  %v5680_v32 = vld [vmem:[%s8410_s6] ss:$16 sps:$4 sm:$0xff]   ;;  %5636 = vset.pattern.permute.xlu1 %v6404_v33 }
  0x29   : > { %5523 = vmatpush3.msra.mxu0 %v418_v36  ;;  %5637 = vset.pattern.permute.xlu0 %v6404_v33  ;;  %v6393_v34 = vld [vmem:[%s6561_s25] sm:$0xff] }
  0x2a   : > { %5524 = vmatprep.subr.mxu0 %v433_v38  ;;  %v6747_v35 = vpack.c.bf16 %v6393_v34, %v6393_v34  ;;  %v5686_v36 = vld [vmem:[%s8410_s6 + $0x1e0] ss:$16 sps:$4 sm:$0xff]   ;;  %v5688_v37 = vld [vmem:[%s8410_s6 + $0x1e4] ss:$16 sps:$4 sm:$0xff]  }
  0x2b   : > { %5525 = vmatpush3.msra.mxu0 %v417_v39  ;;  %v5694_v38 = vld [vmem:[%s8410_s6 + $0x1c4] ss:$16 sps:$4 sm:$0xff]   ;;  %v5692_v39 = vld [vmem:[%s8410_s6 + $0x1c0] ss:$16 sps:$4 sm:$0xff]  }
  0x2c   : > { %514 = vmatmul.mubr.f32.vlgmr.msra.gmra.mxu0 %v416_v40  ;;  %936 = vmatprep.subr.bf16.mxu0 %v5640_v17  ;;  %v5698_v41 = vld [vmem:[%s8410_s6 + $0x1a0] ss:$16 sps:$4 sm:$0xff]   ;;  %v5706_v42 = vld [vmem:[%s8410_s6 + $0x184] ss:$16 sps:$4 sm:$0xff]   ;;  %v5695_v17 = vld [vmem:[%s8410_s6 + $0x1c8] ss:$16 sps:$4 sm:$0xff]  }
  0x2d   : > { %937 = vmatpush1.bf16.msra.mxu0 %v5638_v16  ;;  %968 = vmatprep.mubr.bf16.mxu0 %v6404_v33  ;;  %v5704_v43 = vld [vmem:[%s8410_s6 + $0x180] ss:$16 sps:$4 sm:$0xff]   ;;  %v5712_v44 = vld [vmem:[%s8410_s6 + $0x164] ss:$16 sps:$4 sm:$0xff]   ;;  %v5697_v16 = vld [vmem:[%s8410_s6 + $0x1cc] ss:$16 sps:$4 sm:$0xff]  }
  0x2e   : > { %938 = vmatprep.subr.bf16.mxu0 %v5646_v19  ;;  %v5710_v45 = vld [vmem:[%s8410_s6 + $0x160] ss:$16 sps:$4 sm:$0xff]   ;;  %v5701_v19 = vld [vmem:[%s8410_s6 + $0x1a8] ss:$16 sps:$4 sm:$0xff]  }
  0x31   : > { %939 = vmatpush1.bf16.msra.mxu0 %v5644_v20  ;;  %v5709_v20 = vld [vmem:[%s8410_s6 + $0x18c] ss:$16 sps:$4 sm:$0xff]  }
  0x32   : > { %940 = vmatprep.subr.bf16.mxu0 %v5652_v21  ;;  %v5707_v21 = vld [vmem:[%s8410_s6 + $0x188] ss:$16 sps:$4 sm:$0xff]  }
  0x35   : > { %941 = vmatpush1.bf16.msra.mxu0 %v5650_v22  ;;  %v5715_v22 = vld [vmem:[%s8410_s6 + $0x16c] ss:$16 sps:$4 sm:$0xff]  }
  0x36   : > { %942 = vmatprep.subr.bf16.mxu0 %v5658_v23  ;;  %v5713_v23 = vld [vmem:[%s8410_s6 + $0x168] ss:$16 sps:$4 sm:$0xff]  }
  0x39   : > { %943 = vmatpush1.bf16.msra.mxu0 %v5656_v24  ;;  %v5721_v24 = vld [vmem:[%s8410_s6 + $0x14c] ss:$16 sps:$4 sm:$0xff]  }
  0x3a   : > { %944 = vmatprep.subr.bf16.mxu0 %v5664_v25  ;;  %v5719_v25 = vld [vmem:[%s8410_s6 + $0x148] ss:$16 sps:$4 sm:$0xff]  }
  0x3d   : > { %945 = vmatpush1.bf16.msra.mxu0 %v5662_v26  ;;  %v5727_v26 = vld [vmem:[%s8410_s6 + $0x12c] ss:$16 sps:$4 sm:$0xff]  }
  0x3e   : > { %946 = vmatprep.subr.bf16.mxu0 %v5670_v27  ;;  %v5725_v27 = vld [vmem:[%s8410_s6 + $0x128] ss:$16 sps:$4 sm:$0xff]  }
  0x41   : > { %947 = vmatpush1.bf16.msra.mxu0 %v5668_v28  ;;  %v5733_v28 = vld [vmem:[%s8410_s6 + $0x10c] ss:$16 sps:$4 sm:$0xff]  }
  0x42   : > { %948 = vmatprep.subr.bf16.mxu0 %v5676_v29  ;;  %v5731_v29 = vld [vmem:[%s8410_s6 + $0x108] ss:$16 sps:$4 sm:$0xff]  }
  0x45   : > { %949 = vmatpush1.bf16.msra.mxu0 %v5674_v30  ;;  %v5736_v30 = vld [vmem:[%s8410_s6 + $0x2e4] ss:$16 sps:$4 sm:$0xff]  }
  0x46   : > { %950 = vmatprep.subr.bf16.mxu0 %v5682_v31  ;;  %v5739_v31 = vld [vmem:[%s8410_s6 + $0x2ec] ss:$16 sps:$4 sm:$0xff]  }
  0x49   : > { %951 = vmatpush1.bf16.msra.mxu0 %v5680_v32 }
  0x4a   : > { %1239 = vmatprep.subr.bf16.mxu0 %v5688_v37 }
  0x4c   : > { %969 = vmatmul.mubr.bf16.vlgmr.msra.gmra.mxu0 %v6747_v35 }
  0x4d   : > { %1240 = vmatpush1.bf16.msra.mxu0 %v5686_v36  ;;  %1271 = vmatprep.mubr.bf16.mxu0 %v6404_v33 }
  0x4e   : > { %1241 = vmatprep.subr.bf16.mxu0 %v5694_v38  ;;  %v5734_v38 = vld [vmem:[%s8410_s6 + $0x2e0] ss:$16 sps:$4 sm:$0xff]  }
  0x51   : > { %1242 = vmatpush1.bf16.msra.mxu0 %v5692_v39  ;;  %v5737_v39 = vld [vmem:[%s8410_s6 + $0x2e8] ss:$16 sps:$4 sm:$0xff]  }
  0xec   : > { %v5526_v47 = vpop.f32.mrf.mxu0 }
  0xee   : > { %v5527_v48 = vpop.f32.mrf.mxu0 }
  0xef   : > { %v5528_v49 = vadd.f32 %v5527_v48, %v5526_v47  ;;  %v5716_v47 = vld [vmem:[%s8410_s6 + $0x140] ss:$16 sps:$4 sm:$0xff]   ;;  %v5724_v48 = vld [vmem:[%s8410_s6 + $0x124] ss:$16 sps:$4 sm:$0xff]  }
  0xf1   : > { %4906 = vmatmul.mubr.msk.f32.vlgmr.msra.gmra.mxu1 %vm527_vm0, %v5528_v49  ;;  %v5722_v49 = vld [vmem:[%s8410_s6 + $0x120] ss:$16 sps:$4 sm:$0xff]  }
  0xf2   : > { %5591 = vmatpush3.msra.mxu1 %v650_v60  ;;  %5622 = vmatprep.mubr.msk.f32.mxu1 %vm6403_vm1, %v6402_v46 }
  0xf3   : > { %5592 = vmatprep.subr.mxu1 %v6402_v46 }
  0xf4   : > { %5593 = vmatpush3.msra.mxu1 %v649_v61 }
  0xf5   : > { %5594 = vmatprep.subr.mxu1 %v6402_v46 }
  0xf6   : > { %5595 = vmatpush3.msra.mxu1 %v648_v62  ;;  %v5641_v62 = vld [vmem:[%s8410_s6 + $0xe8] ss:$16 sps:$4 sm:$0xff]  }
  0xf7   : > { %5596 = vmatprep.subr.mxu1 %v6402_v46 }
  0xf8   : > { %5597 = vmatpush3.msra.mxu1 %v647_v3  ;;  %v5653_v3 = vld [vmem:[%s8410_s6 + $0xa8] ss:$16 sps:$4 sm:$0xff]  }
  0xf9   : > { %5598 = vmatprep.subr.mxu1 %v6402_v46 }
  0xfa   : > { %5599 = vmatpush3.msra.mxu1 %v646_v4  ;;  %v5661_v4 = vld [vmem:[%s8410_s6 + $0x8c] ss:$16 sps:$4 sm:$0xff]  }
  0xfb   : > { %5600 = vmatprep.subr.mxu1 %v6402_v46 }
  0xfc   : > { %5601 = vmatpush3.msra.mxu1 %v645_v5  ;;  %v5659_v5 = vld [vmem:[%s8410_s6 + $0x88] ss:$16 sps:$4 sm:$0xff]  }
  0xfd   : > { %5602 = vmatprep.subr.mxu1 %v6402_v46 }
  0xfe   : > { %5603 = vmatpush3.msra.mxu1 %v644_v6  ;;  %v5667_v6 = vld [vmem:[%s8410_s6 + $0x6c] ss:$16 sps:$4 sm:$0xff]  }
  0xff   : > { %5604 = vmatprep.subr.mxu1 %v6402_v46 }
 0x100   : > { %5605 = vmatpush3.msra.mxu1 %v643_v7  ;;  %v5665_v7 = vld [vmem:[%s8410_s6 + $0x68] ss:$16 sps:$4 sm:$0xff]  }
 0x101   : > { %5606 = vmatprep.subr.mxu1 %v6402_v46 }
 0x102   : > { %5607 = vmatpush3.msra.mxu1 %v642_v8  ;;  %v5673_v8 = vld [vmem:[%s8410_s6 + $0x4c] ss:$16 sps:$4 sm:$0xff]  }
 0x103   : > { %5608 = vmatprep.subr.mxu1 %v6402_v46 }
 0x104   : > { %5609 = vmatpush3.msra.mxu1 %v641_v9  ;;  %v5671_v9 = vld [vmem:[%s8410_s6 + $0x48] ss:$16 sps:$4 sm:$0xff]  }
 0x105   : > { %5610 = vmatprep.subr.mxu1 %v6402_v46 }
 0x106   : > { %5611 = vmatpush3.msra.mxu1 %v640_v10  ;;  %v5679_v10 = vld [vmem:[%s8410_s6 + $0x2c] ss:$16 sps:$4 sm:$0xff]  }
 0x107   : > { %5612 = vmatprep.subr.mxu1 %v6402_v46 }
 0x108   : > { %5613 = vmatpush3.msra.mxu1 %v639_v11  ;;  %v5677_v11 = vld [vmem:[%s8410_s6 + $0x28] ss:$16 sps:$4 sm:$0xff]  }
 0x109   : > { %5614 = vmatprep.subr.mxu1 %v6402_v46 }
 0x10a   : > { %5615 = vmatpush3.msra.mxu1 %v638_v12  ;;  %v5685_v12 = vld [vmem:[%s8410_s6 + $0xc] ss:$16 sps:$4 sm:$0xff]  }
 0x10b   : > { %5616 = vmatprep.subr.mxu1 %v6402_v46 }
 0x10c   : > { %5617 = vmatpush3.msra.mxu1 %v637_v13  ;;  %v5683_v13 = vld [vmem:[%s8410_s6 + $0x8] ss:$16 sps:$4 sm:$0xff]   ;;  %v6908_v32 = vpop.f32.mrf.mxu0 }
 0x10d   : > { %5618 = vmatprep.subr.mxu1 %v6402_v46 }
 0x10e   : > { %5619 = vmatpush3.msra.mxu1 %v636_v14  ;;  %v5691_v14 = vld [vmem:[%s8410_s6 + $0x1ec] ss:$16 sps:$4 sm:$0xff]   ;;  %v6910_v34 = vpop.f32.mrf.mxu0 }
 0x10f   : > { %5620 = vmatprep.subr.mxu1 %v6402_v46  ;;  %v5718_v46 = vld [vmem:[%s8410_s6 + $0x144] ss:$16 sps:$4 sm:$0xff]  }
 0x110   : > { %5621 = vmatpush3.msra.mxu1 %v635_v15  ;;  %v5689_v15 = vld [vmem:[%s8410_s6 + $0x1e8] ss:$16 sps:$4 sm:$0xff]  }
 0x111   : > { %977 = vmatprep.subr.bf16.mxu1 %v5643_v18  ;;  %v5703_v18 = vld [vmem:[%s8410_s6 + $0x1ac] ss:$16 sps:$4 sm:$0xff]  }
 0x1b1   : > { %v597_v50 = vpop.f32.mrf.mxu1 }
 0x1b2   : > { %v602_v52 = vmul.f32 %v597_v50, %v416_v40  ;;  %v5730_v50 = vld [vmem:[%s8410_s6 + $0x104] ss:$16 sps:$4 sm:$0xff]  }
 0x1b3   : > { %v599_v51 = vpop.f32.mrf.mxu1 }
 0x1b4   : > { %v603_v54 = vmul.f32 %v6618_v53, %v599_v51  ;;  %v5728_v51 = vld [vmem:[%s8410_s6 + $0x100] ss:$16 sps:$4 sm:$0xff]  }
 0x1b6   : > { %v604_v55 = vadd.f32 %v603_v54, %v602_v52 }
 0x1b8   : > { %v605_v57 = vmul.f32 0.17677669, %v604_v55 }
 0x1ba   : > { %v610_v58 = vadd.f32 %v4907_v56, %v605_v57  ;;  %v4908_v57 = vld [vmem:[%s8409_s5 + $0x1] ss:$0 sm:$0xff] }
 0x1bc   : > { %v611_v59 = vmul.f32 %v610_v58, %v416_v40  ;;  %v5700_v40 = vld [vmem:[%s8410_s6 + $0x1a4] ss:$16 sps:$4 sm:$0xff]  }
 0x1bd   : > { %1243 = vmatprep.subr.bf16.mxu0 %v5700_v40 }
 0x1be   : > { %612 = vadd.xlane.f32.xlu0 %v611_v59  ;;  %1244 = vmatpush1.bf16.msra.mxu0 %v5698_v41  ;;  %v5742_v41 = vld [vmem:[%s8410_s6 + $0x2c4] ss:$16 sps:$4 sm:$0xff]  }
 0x1bf   : > { %1245 = vmatprep.subr.bf16.mxu0 %v5706_v42  ;;  %v5745_v42 = vld [vmem:[%s8410_s6 + $0x2cc] ss:$16 sps:$4 sm:$0xff]  }
 0x1c2   : > { %1246 = vmatpush1.bf16.msra.mxu0 %v5704_v43 }
 0x1c3   : > { %1247 = vmatprep.subr.bf16.mxu0 %v5712_v44  ;;  %v5740_v44 = vld [vmem:[%s8410_s6 + $0x2c0] ss:$16 sps:$4 sm:$0xff]  }
 0x1c6   : > { %1248 = vmatpush1.bf16.msra.mxu0 %v5710_v45  ;;  %v5743_v45 = vld [vmem:[%s8410_s6 + $0x2c8] ss:$16 sps:$4 sm:$0xff]  }
 0x1c7   : > { %1249 = vmatprep.subr.bf16.mxu0 %v5718_v46  ;;  %v5748_v46 = vld [vmem:[%s8410_s6 + $0x2a4] ss:$16 sps:$4 sm:$0xff]  }
 0x1ca   : > { %1250 = vmatpush1.bf16.msra.mxu0 %v5716_v47  ;;  %v5751_v47 = vld [vmem:[%s8410_s6 + $0x2ac] ss:$16 sps:$4 sm:$0xff]  }
 0x1cb   : > { %1251 = vmatprep.subr.bf16.mxu0 %v5724_v48  ;;  %v5746_v48 = vld [vmem:[%s8410_s6 + $0x2a0] ss:$16 sps:$4 sm:$0xff]  }
 0x1ce   : > { %1252 = vmatpush1.bf16.msra.mxu0 %v5722_v49  ;;  %v5749_v49 = vld [vmem:[%s8410_s6 + $0x2a8] ss:$16 sps:$4 sm:$0xff]  }
 0x1cf   : > { %1253 = vmatprep.subr.bf16.mxu0 %v5730_v50  ;;  %v5754_v50 = vld [vmem:[%s8410_s6 + $0x284] ss:$16 sps:$4 sm:$0xff]  }
 0x1d2   : > { %1254 = vmatpush1.bf16.msra.mxu0 %v5728_v51  ;;  %v756_v51 = vlaneseq }
 0x1d3   : > { %1542 = vmatprep.subr.bf16.mxu0 %v5736_v30 }
 0x247   : > { %v613_v63 = vpop.xlane.xlu0 %612 }
 0x248   : > { %v615_v0 = vmul.f32 0.0078125, %v613_v63 }
 0x24a   : > { %v6636_v1 = vsub.f32 %v611_v59, %v615_v0  ;;  %v4909_v59 = vld [vmem:[%s8409_s5 + $0x2] ss:$0 sm:$0xff]  ;;  %v5649_v0 = vld [vmem:[%s8410_s6 + $0xcc] ss:$16 sps:$4 sm:$0xff]  }
 0x24c   : > { %v617_v2 = vmul.f32 %v6636_v1, %v6636_v1 }
 0x24e   : > { %618 = vadd.xlane.f32.xlu0 %v617_v2  ;;  %v5655_v2 = vld [vmem:[%s8410_s6 + $0xac] ss:$16 sps:$4 sm:$0xff]  }
 0x2d7   : > { %v619_v52 = vpop.xlane.xlu0 %618 }
 0x2d8   : > { %v620_v54 = vmul.f32 0.0078125, %v619_v52  ;;  %v5752_v52 = vld [vmem:[%s8410_s6 + $0x280] ss:$16 sps:$4 sm:$0xff]  }
 0x2da   : > { %v621_v55 = vadd.f32 1e-05, %v620_v54  ;;  %v5755_v54 = vld [vmem:[%s8410_s6 + $0x288] ss:$16 sps:$4 sm:$0xff]  }
 0x2dc   : > { %6390 = vrsqrt.f32 %v621_v55  ;;  %v5760_v55 = vld [vmem:[%s8410_s6 + $0x264] ss:$16 sps:$4 sm:$0xff]  }
 0x2e9   : > { %v6391_v56 = vpop.eup %6390 }
 0x2ea   : > { %v623_v58 = vmul.f32 %v6391_v56, %v6636_v1  ;;  %v5647_v1 = vld [vmem:[%s8410_s6 + $0xc8] ss:$16 sps:$4 sm:$0xff]   ;;  %v5763_v56 = vld [vmem:[%s8410_s6 + $0x26c] ss:$16 sps:$4 sm:$0xff]  }
 0x2ec   : > { %v628_v60 = vmul.f32 %v4908_v57, %v623_v58  ;;  %v6962_v57 = vshrl.u32 %v756_v51, 7  ;;  %v5758_v58 = vld [vmem:[%s8410_s6 + $0x260] ss:$16 sps:$4 sm:$0xff]  }
 0x2ed   : > { %v5821_v51 = vld [vmem:[%s8412_s8 + $0x220] ss:$16 sps:$4 sm:$0xff]  }
 0x2ee   : > { %v633_v61 = vadd.f32 %v4909_v59, %v628_v60  ;;  %v5761_v59 = vld [vmem:[%s8410_s6 + $0x268] ss:$16 sps:$4 sm:$0xff]   ;;  %v5766_v60 = vld [vmem:[%s8410_s6 + $0x244] ss:$16 sps:$4 sm:$0xff]  }
 0x2f0   : > { %v634_v63 = vmax.f32 %v633_v61, 0.0  ;;  %v5769_v61 = vld [vmem:[%s8410_s6 + $0x24c] ss:$16 sps:$4 sm:$0xff]  }
 0x2f2   : > { %5623 = vmatmul.mubr.f32.vlgmr.msra.gmra.mxu1 %v634_v63  ;;  %v6982_v63 = vld [vmem:[%s8411_s7] ss:$4 sm:$0xf] }
 0x2f3   : > { %978 = vmatpush1.bf16.msra.mxu1 %v5641_v62  ;;  %1009 = vmatprep.mubr.bf16.mxu1 %v6404_v33  ;;  %v6977_v62 = vsub.s32 1, %v6962_v57 }
 0x2f4   : > { %979 = vmatprep.subr.bf16.mxu1 %v5649_v0  ;;  %v5764_v0 = vld [vmem:[%s8410_s6 + $0x240] ss:$16 sps:$4 sm:$0xff]  }
 0x2f7   : > { %980 = vmatpush1.bf16.msra.mxu1 %v5647_v1  ;;  %v5767_v1 = vld [vmem:[%s8410_s6 + $0x248] ss:$16 sps:$4 sm:$0xff]  }
 0x2f8   : > { %981 = vmatprep.subr.bf16.mxu1 %v5655_v2  ;;  %v5772_v2 = vld [vmem:[%s8410_s6 + $0x224] ss:$16 sps:$4 sm:$0xff]  }
 0x2fb   : > { %982 = vmatpush1.bf16.msra.mxu1 %v5653_v3  ;;  %v5775_v3 = vld [vmem:[%s8410_s6 + $0x22c] ss:$16 sps:$4 sm:$0xff]  }
 0x2fc   : > { %983 = vmatprep.subr.bf16.mxu1 %v5661_v4  ;;  %v763_v4 = vrot.slane %v6982_v63, %v6977_v62 }
 0x2ff   : > { %984 = vmatpush1.bf16.msra.mxu1 %v5659_v5  ;;  %v5770_v5 = vld [vmem:[%s8410_s6 + $0x220] ss:$16 sps:$4 sm:$0xff]  }
 0x300   : > { %985 = vmatprep.subr.bf16.mxu1 %v5667_v6  ;;  %v5773_v6 = vld [vmem:[%s8410_s6 + $0x228] ss:$16 sps:$4 sm:$0xff]  }
 0x303   : > { %986 = vmatpush1.bf16.msra.mxu1 %v5665_v7  ;;  %v5778_v7 = vld [vmem:[%s8410_s6 + $0x204] ss:$16 sps:$4 sm:$0xff]  }
 0x304   : > { %987 = vmatprep.subr.bf16.mxu1 %v5673_v8  ;;  %v5781_v8 = vld [vmem:[%s8410_s6 + $0x20c] ss:$16 sps:$4 sm:$0xff]  }
 0x307   : > { %988 = vmatpush1.bf16.msra.mxu1 %v5671_v9  ;;  %v973_v9 = vadd.f32 %v6910_v34, %v763_v4  ;;  %v5844_v4 = vld [vmem:[%s8412_s8 + $0x1a4] ss:$16 sps:$4 sm:$0xff]  }
 0x308   : > { %989 = vmatprep.subr.bf16.mxu1 %v5679_v10  ;;  %v7012_v10 = vsub.s32 3, %v6962_v57 }
 0x30b   : > { %990 = vmatpush1.bf16.msra.mxu1 %v5677_v11  ;;  %v5776_v11 = vld [vmem:[%s8410_s6 + $0x200] ss:$16 sps:$4 sm:$0xff]  }
 0x30c   : > { %991 = vmatprep.subr.bf16.mxu1 %v5685_v12  ;;  %v5779_v12 = vld [vmem:[%s8410_s6 + $0x208] ss:$16 sps:$4 sm:$0xff]  }
 0x30f   : > { %992 = vmatpush1.bf16.msra.mxu1 %v5683_v13  ;;  %v5784_v13 = vld [vmem:[%s8412_s8 + $0xe4] ss:$16 sps:$4 sm:$0xff]  }
 0x310   : > { %1280 = vmatprep.subr.bf16.mxu1 %v5691_v14  ;;  %v5787_v14 = vld [vmem:[%s8412_s8 + $0x2e4] ss:$16 sps:$4 sm:$0xff]  }
 0x312   : > { %1010 = vmatmul.mubr.bf16.vlgmr.msra.gmra.mxu1 %v6747_v35  ;;  %v974_v35 = vpop.f32.mrf.mxu0 }
 0x313   : > { %1281 = vmatpush1.bf16.msra.mxu1 %v5689_v15  ;;  %1312 = vmatprep.mubr.bf16.mxu1 %v6404_v33  ;;  %v1019_v15 = vmax.f32 %v973_v9, 0.0  ;;  %v5794_v35 = vld [vmem:[%s8412_s8 + $0xa0] ss:$16 sps:$4 sm:$0xff]   ;;  %v5853_v9 = vld [vmem:[%s8412_s8 + $0x384] ss:$16 sps:$4 sm:$0xff]  }
 0x314   : > { %1282 = vmatprep.subr.bf16.mxu1 %v5697_v16  ;;  %v975_v36 = vpop.f32.mrf.mxu0  ;;  %v1325_v16 = vpack.c.bf16 %v6618_v53, %v6618_v53  ;;  %v5790_v53 = vld [vmem:[%s8412_s8 + $0xc4] ss:$16 sps:$4 sm:$0xff]  }
 0x315   : > { %v5797_v36 = vld [vmem:[%s8412_s8 + $0x2a0] ss:$16 sps:$4 sm:$0xff]  }
 0x317   : > { %1283 = vmatpush1.bf16.msra.mxu1 %v5695_v17  ;;  %v771_v17 = vrot.slane %v6982_v63, %v7012_v10 }
 0x318   : > { %1284 = vmatprep.subr.bf16.mxu1 %v5703_v18  ;;  %v5782_v18 = vld [vmem:[%s8412_s8 + $0xe0] ss:$16 sps:$4 sm:$0xff]  }
 0x31b   : > { %1285 = vmatpush1.bf16.msra.mxu1 %v5701_v19  ;;  %v5785_v19 = vld [vmem:[%s8412_s8 + $0x2e0] ss:$16 sps:$4 sm:$0xff]  }
 0x31c   : > { %1286 = vmatprep.subr.bf16.mxu1 %v5709_v20 }
 0x31f   : > { %1287 = vmatpush1.bf16.msra.mxu1 %v5707_v21  ;;  %v5793_v21 = vld [vmem:[%s8412_s8 + $0x2c4] ss:$16 sps:$4 sm:$0xff]  }
 0x320   : > { %1288 = vmatprep.subr.bf16.mxu1 %v5715_v22  ;;  %v7044_v22 = vpack.c.bf16 %v1019_v15, %v1019_v15  ;;  %v7183_v15 = vsub.s32 0, %v6962_v57 }
 0x323   : > { %1289 = vmatpush1.bf16.msra.mxu1 %v5713_v23 }
 0x324   : > { %1290 = vmatprep.subr.bf16.mxu1 %v5721_v24 }
 0x327   : > { %1291 = vmatpush1.bf16.msra.mxu1 %v5719_v25  ;;  %v5788_v25 = vld [vmem:[%s8412_s8 + $0xc0] ss:$16 sps:$4 sm:$0xff]  }
 0x328   : > { %1292 = vmatprep.subr.bf16.mxu1 %v5727_v26  ;;  %v5791_v26 = vld [vmem:[%s8412_s8 + $0x2c0] ss:$16 sps:$4 sm:$0xff]  }
 0x32b   : > { %1293 = vmatpush1.bf16.msra.mxu1 %v5725_v27 }
 0x32c   : > { %1294 = vmatprep.subr.bf16.mxu1 %v5733_v28  ;;  %v5796_v28 = vld [vmem:[%s8412_s8 + $0xa4] ss:$16 sps:$4 sm:$0xff]  }
 0x32f   : > { %1295 = vmatpush1.bf16.msra.mxu1 %v5731_v29  ;;  %v5799_v29 = vld [vmem:[%s8412_s8 + $0x2a4] ss:$16 sps:$4 sm:$0xff]  }
 0x330   : > { %1583 = vmatprep.subr.bf16.mxu1 %v5739_v31 }
 0x3b2   : > { %v717_v37 = vpop.f32.mrf.mxu1 }
 0x3b3   : > { %v1022_v40 = vpack.c.bf16 %v717_v37, %v717_v37  ;;  %v5802_v37 = vld [vmem:[%s8412_s8 + $0x84] ss:$16 sps:$4 sm:$0xff]  }
 0x3b4   : > { %v5624_v43 = vpop.f32.mrf.mxu1 }
 0x3b5   : > { %1272 = vmatmul.mubr.bf16.vlgmr.msra.gmra.mxu0 %v1022_v40  ;;  %1313 = vmatmul.mubr.bf16.vlgmr.msra.gmra.mxu1 %v1022_v40  ;;  %v5803_v40 = vld [vmem:[%s8412_s8 + $0x280] ss:$16 sps:$4 sm:$0xff]  }
 0x3b6   : > { %1543 = vmatpush1.bf16.msra.mxu0 %v5734_v38  ;;  %1584 = vmatpush1.bf16.msra.mxu1 %v5737_v39  ;;  %v5805_v38 = vld [vmem:[%s8412_s8 + $0x284] ss:$16 sps:$4 sm:$0xff]   ;;  %v5800_v39 = vld [vmem:[%s8412_s8 + $0x80] ss:$16 sps:$4 sm:$0xff]  }
 0x3b7   : > { %1544 = vmatprep.subr.bf16.mxu0 %v5742_v41  ;;  %1585 = vmatprep.subr.bf16.mxu1 %v5745_v42  ;;  %v5808_v41 = vld [vmem:[%s8412_s8 + $0x64] ss:$16 sps:$4 sm:$0xff]   ;;  %v5806_v43 = vld [vmem:[%s8412_s8 + $0x60] ss:$16 sps:$4 sm:$0xff]  }
 0x3b8   : > { %1574 = vmatprep.mubr.bf16.mxu0 %v6404_v33  ;;  %1615 = vmatprep.mubr.bf16.mxu1 %v6404_v33  ;;  %v5757_v33 = vld [vmem:[%s8410_s6 + $0x28c] ss:$16 sps:$4 sm:$0xff]   ;;  %v5811_v42 = vld [vmem:[%s8412_s8 + $0x264] ss:$16 sps:$4 sm:$0xff]  }
 0x3ba   : > { %1545 = vmatpush1.bf16.msra.mxu0 %v5740_v44  ;;  %1586 = vmatpush1.bf16.msra.mxu1 %v5743_v45  ;;  %v5809_v44 = vld [vmem:[%s8412_s8 + $0x260] ss:$16 sps:$4 sm:$0xff]   ;;  %v5814_v45 = vld [vmem:[%s8412_s8 + $0x44] ss:$16 sps:$4 sm:$0xff]  }
 0x3bb   : > { %1546 = vmatprep.subr.bf16.mxu0 %v5748_v46  ;;  %1587 = vmatprep.subr.bf16.mxu1 %v5751_v47  ;;  %v5817_v46 = vld [vmem:[%s8412_s8 + $0x244] ss:$16 sps:$4 sm:$0xff]   ;;  %v5812_v47 = vld [vmem:[%s8412_s8 + $0x40] ss:$16 sps:$4 sm:$0xff]  }
 0x3be   : > { %1547 = vmatpush1.bf16.msra.mxu0 %v5746_v48  ;;  %1588 = vmatpush1.bf16.msra.mxu1 %v5749_v49  ;;  %v5815_v48 = vld [vmem:[%s8412_s8 + $0x240] ss:$16 sps:$4 sm:$0xff]   ;;  %v5820_v49 = vld [vmem:[%s8412_s8 + $0x24] ss:$16 sps:$4 sm:$0xff]  }
 0x3bf   : > { %1548 = vmatprep.subr.bf16.mxu0 %v5754_v50  ;;  %1589 = vmatprep.subr.bf16.mxu1 %v5757_v33  ;;  %v5823_v50 = vld [vmem:[%s8412_s8 + $0x224] ss:$16 sps:$4 sm:$0xff]   ;;  %v5818_v33 = vld [vmem:[%s8412_s8 + $0x20] ss:$16 sps:$4 sm:$0xff]  }
 0x3c2   : > { %1549 = vmatpush1.bf16.msra.mxu0 %v5752_v52  ;;  %1590 = vmatpush1.bf16.msra.mxu1 %v5755_v54  ;;  %v5826_v52 = vld [vmem:[%s8412_s8 + $0x4] ss:$16 sps:$4 sm:$0xff]  }
 0x3c3   : > { %1550 = vmatprep.subr.bf16.mxu0 %v5760_v55  ;;  %1591 = vmatprep.subr.bf16.mxu1 %v5763_v56  ;;  %v5829_v54 = vld [vmem:[%s8412_s8 + $0x204] ss:$16 sps:$4 sm:$0xff]   ;;  %v5824_v55 = vld [vmem:[%s8412_s8] ss:$16 sps:$4 sm:$0xff]  }
 0x3c4   : > { %v5827_v56 = vld [vmem:[%s8412_s8 + $0x200] ss:$16 sps:$4 sm:$0xff]  }
 0x3c6   : > { %1551 = vmatpush1.bf16.msra.mxu0 %v5758_v58  ;;  %1592 = vmatpush1.bf16.msra.mxu1 %v5761_v59  ;;  %v5832_v58 = vld [vmem:[%s8412_s8 + $0x1e4] ss:$16 sps:$4 sm:$0xff]  }
 0x3c7   : > { %1552 = vmatprep.subr.bf16.mxu0 %v5766_v60  ;;  %1593 = vmatprep.subr.bf16.mxu1 %v5769_v61  ;;  %v5835_v59 = vld [vmem:[%s8412_s8 + $0x3e4] ss:$16 sps:$4 sm:$0xff]   ;;  %v5830_v60 = vld [vmem:[%s8412_s8 + $0x1e0] ss:$16 sps:$4 sm:$0xff]  }
 0x3c8   : > { %v5833_v61 = vld [vmem:[%s8412_s8 + $0x3e0] ss:$16 sps:$4 sm:$0xff]  }
 0x3ca   : > { %1553 = vmatpush1.bf16.msra.mxu0 %v5764_v0  ;;  %1594 = vmatpush1.bf16.msra.mxu1 %v5767_v1  ;;  %v5838_v0 = vld [vmem:[%s8412_s8 + $0x1c4] ss:$16 sps:$4 sm:$0xff]  }
 0x3cb   : > { %1554 = vmatprep.subr.bf16.mxu0 %v5772_v2  ;;  %1595 = vmatprep.subr.bf16.mxu1 %v5775_v3  ;;  %v5841_v1 = vld [vmem:[%s8412_s8 + $0x3c4] ss:$16 sps:$4 sm:$0xff]   ;;  %v5836_v2 = vld [vmem:[%s8412_s8 + $0x1c0] ss:$16 sps:$4 sm:$0xff]  }
 0x3cc   : > { %v5839_v3 = vld [vmem:[%s8412_s8 + $0x3c0] ss:$16 sps:$4 sm:$0xff]  }
 0x3ce   : > { %1555 = vmatpush1.bf16.msra.mxu0 %v5770_v5  ;;  %1596 = vmatpush1.bf16.msra.mxu1 %v5773_v6  ;;  %v5847_v5 = vld [vmem:[%s8412_s8 + $0x3a4] ss:$16 sps:$4 sm:$0xff]   ;;  %v5842_v6 = vld [vmem:[%s8412_s8 + $0x1a0] ss:$16 sps:$4 sm:$0xff]  }
 0x3cf   : > { %1556 = vmatprep.subr.bf16.mxu0 %v5778_v7  ;;  %1597 = vmatprep.subr.bf16.mxu1 %v5781_v8  ;;  %v5845_v7 = vld [vmem:[%s8412_s8 + $0x3a0] ss:$16 sps:$4 sm:$0xff]   ;;  %v5850_v8 = vld [vmem:[%s8412_s8 + $0x184] ss:$16 sps:$4 sm:$0xff]  }
 0x3d2   : > { %1557 = vmatpush1.bf16.msra.mxu0 %v5776_v11  ;;  %1598 = vmatpush1.bf16.msra.mxu1 %v5779_v12  ;;  %v7036_v20 = vpop.f32.mrf.mxu1  ;;  %v5848_v11 = vld [vmem:[%s8412_s8 + $0x180] ss:$16 sps:$4 sm:$0xff]  }
 0x3d3   : > { %3967 = vmatprep.subr.bf16.mxu0 %v5784_v13  ;;  %4008 = vmatprep.subr.bf16.mxu1 %v5787_v14  ;;  %v5851_v12 = vld [vmem:[%s8412_s8 + $0x380] ss:$16 sps:$4 sm:$0xff]   ;;  %v5856_v13 = vld [vmem:[%s8412_s8 + $0x164] ss:$16 sps:$4 sm:$0xff]  }
 0x3d4   : > { %v1013_v23 = vpop.f32.mrf.mxu1  ;;  %v5859_v14 = vld [vmem:[%s8412_s8 + $0x364] ss:$16 sps:$4 sm:$0xff]  }
 0x3d5   : > { %1575 = vmatmul.mubr.bf16.vlgmr.msra.gmra.mxu0 %v1325_v16  ;;  %1616 = vmatmul.mubr.bf16.vlgmr.msra.gmra.mxu1 %v1325_v16  ;;  %v1014_v24 = vadd.f32 %v1013_v23, %v771_v17  ;;  %v7186_v16 = vsub.s32 2, %v6962_v57  ;;  %v5854_v17 = vld [vmem:[%s8412_s8 + $0x160] ss:$16 sps:$4 sm:$0xff]   ;;  %v5865_v57 = vld [vmem:[%s8412_s8 + $0x344] ss:$16 sps:$4 sm:$0xff]  }
 0x3d6   : > { %3968 = vmatpush1.bf16.msra.mxu0 %v5782_v18  ;;  %4009 = vmatpush1.bf16.msra.mxu1 %v5785_v19  ;;  %v1015_v27 = vpop.f32.mrf.mxu1  ;;  %v5857_v18 = vld [vmem:[%s8412_s8 + $0x360] ss:$16 sps:$4 sm:$0xff]   ;;  %v5862_v19 = vld [vmem:[%s8412_s8 + $0x144] ss:$16 sps:$4 sm:$0xff]  }
 0x3d7   : > { %3969 = vmatprep.subr.bf16.mxu0 %v5790_v53  ;;  %4010 = vmatprep.subr.bf16.mxu1 %v5793_v21  ;;  %v1021_v30 = vmax.f32 %v1014_v24, 0.0  ;;  %v759_v53 = vrot.slane %v6982_v63, %v7183_v15  ;;  %v767_v21 = vrot.slane %v6982_v63, %v7186_v16  ;;  %v5860_v23 = vld [vmem:[%s8412_s8 + $0x140] ss:$16 sps:$4 sm:$0xff]   ;;  %v5871_v63 = vld [vmem:[%s8412_s8 + $0x324] ss:$16 sps:$4 sm:$0xff]  }
 0x3d8   : > { %3999 = vmatprep.mubr.bf16.mxu0 %v7044_v22  ;;  %v1016_v31 = vpop.f32.mrf.mxu1  ;;  %v5863_v24 = vld [vmem:[%s8412_s8 + $0x340] ss:$16 sps:$4 sm:$0xff]  }
 0x3d9   : > { %v7059_v34 = vpack.c.bf16 %v1021_v30, %v1021_v30  ;;  %v1012_v27 = vadd.f32 %v7036_v20, %v767_v21  ;;  %v5874_v30 = vld [vmem:[%s8412_s8 + $0x104] ss:$16 sps:$4 sm:$0xff]  }
 0x3da   : > { %3970 = vmatpush1.bf16.msra.mxu0 %v5788_v25  ;;  %4011 = vmatpush1.bf16.msra.mxu1 %v5791_v26  ;;  %v5868_v25 = vld [vmem:[%s8412_s8 + $0x124] ss:$16 sps:$4 sm:$0xff]   ;;  %v971_v26 = vadd.f32 %v6908_v32, %v759_v53 }
 0x3db   : > { %3971 = vmatprep.subr.bf16.mxu0 %v5796_v28  ;;  %4012 = vmatprep.subr.bf16.mxu1 %v5799_v29  ;;  %v5866_v28 = vld [vmem:[%s8412_s8 + $0x120] ss:$16 sps:$4 sm:$0xff]   ;;  %v5877_v32 = vld [vmem:[%s8412_s8 + $0x304] ss:$16 sps:$4 sm:$0xff]   ;;  %v1020_v31 = vmax.f32 %v1012_v27, 0.0 }
 0x3dc   : > { %4040 = vmatprep.mubr.bf16.mxu1 %v7059_v34  ;;  %v5869_v29 = vld [vmem:[%s8412_s8 + $0x320] ss:$16 sps:$4 sm:$0xff]   ;;  %v1018_v20 = vmax.f32 %v971_v26, 0.0  ;;  %v5940_v53 = vld [vmem:[%s8412_s8 + $0x5a4] ss:$16 sps:$4 sm:$0xff]  }
 0x3dd   : > { %v5943_v21 = vld [vmem:[%s8412_s8 + $0x7a4] ss:$16 sps:$4 sm:$0xff]   ;;  %v5944_v26 = vld [vmem:[%s8412_s8 + $0x580] ss:$16 sps:$4 sm:$0xff]  }
 0x3de   : > { %3972 = vmatpush1.bf16.msra.mxu0 %v5794_v35  ;;  %4013 = vmatpush1.bf16.msra.mxu1 %v5797_v36  ;;  %v5872_v35 = vld [vmem:[%s8412_s8 + $0x100] ss:$16 sps:$4 sm:$0xff]  }
 0x3df   : > { %3973 = vmatprep.subr.bf16.mxu0 %v5802_v37  ;;  %4014 = vmatprep.subr.bf16.mxu1 %v5805_v38  ;;  %v5875_v36 = vld [vmem:[%s8412_s8 + $0x300] ss:$16 sps:$4 sm:$0xff]   ;;  %v5880_v37 = vld [vmem:[%s8412_s8 + $0x4e4] ss:$16 sps:$4 sm:$0xff]  }
 0x3e0   : > { %v5883_v38 = vld [vmem:[%s8412_s8 + $0x6e4] ss:$16 sps:$4 sm:$0xff]   ;;  %v5947_v27 = vld [vmem:[%s8412_s8 + $0x780] ss:$16 sps:$4 sm:$0xff]  }
 0x3e2   : > { %3974 = vmatpush1.bf16.msra.mxu0 %v5800_v39  ;;  %4015 = vmatpush1.bf16.msra.mxu1 %v5803_v40  ;;  %v7242_v39 = vpack.c.bf16 %v1018_v20, %v1018_v20  ;;  %v7244_v40 = vpack.c.bf16 %v1020_v31, %v1020_v31  ;;  %v5958_v20 = vld [vmem:[%s8412_s8 + $0x544] ss:$16 sps:$4 sm:$0xff]  }
 0x3e3   : > { %3975 = vmatprep.subr.bf16.mxu0 %v5808_v41  ;;  %4016 = vmatprep.subr.bf16.mxu1 %v5811_v42  ;;  %v5878_v41 = vld [vmem:[%s8412_s8 + $0x4e0] ss:$16 sps:$4 sm:$0xff]   ;;  %v5961_v31 = vld [vmem:[%s8412_s8 + $0x744] ss:$16 sps:$4 sm:$0xff]  }
 0x3e4   : > { %v5881_v42 = vld [vmem:[%s8412_s8 + $0x6e0] ss:$16 sps:$4 sm:$0xff]  }
 0x3e6   : > { %3976 = vmatpush1.bf16.msra.mxu0 %v5806_v43  ;;  %4017 = vmatpush1.bf16.msra.mxu1 %v5809_v44  ;;  %v5886_v43 = vld [vmem:[%s8412_s8 + $0x4c4] ss:$16 sps:$4 sm:$0xff]  }
 0x3e7   : > { %3977 = vmatprep.subr.bf16.mxu0 %v5814_v45  ;;  %4018 = vmatprep.subr.bf16.mxu1 %v5817_v46  ;;  %v5889_v44 = vld [vmem:[%s8412_s8 + $0x6c4] ss:$16 sps:$4 sm:$0xff]   ;;  %v5884_v45 = vld [vmem:[%s8412_s8 + $0x4c0] ss:$16 sps:$4 sm:$0xff]  }
 0x3e8   : > { %v5887_v46 = vld [vmem:[%s8412_s8 + $0x6c0] ss:$16 sps:$4 sm:$0xff]  }
 0x3ea   : > { %3978 = vmatpush1.bf16.msra.mxu0 %v5812_v47  ;;  %4019 = vmatpush1.bf16.msra.mxu1 %v5815_v48  ;;  %v5892_v47 = vld [vmem:[%s8412_s8 + $0x4a4] ss:$16 sps:$4 sm:$0xff]  }
 0x3eb   : > { %3979 = vmatprep.subr.bf16.mxu0 %v5820_v49  ;;  %4020 = vmatprep.subr.bf16.mxu1 %v5823_v50  ;;  %v5895_v48 = vld [vmem:[%s8412_s8 + $0x6a4] ss:$16 sps:$4 sm:$0xff]   ;;  %v5890_v49 = vld [vmem:[%s8412_s8 + $0x4a0] ss:$16 sps:$4 sm:$0xff]  }
 0x3ec   : > { %v5893_v50 = vld [vmem:[%s8412_s8 + $0x6a0] ss:$16 sps:$4 sm:$0xff]  }
 0x3ee   : > { %3980 = vmatpush1.bf16.msra.mxu0 %v5818_v33  ;;  %4021 = vmatpush1.bf16.msra.mxu1 %v5821_v51  ;;  %v5898_v33 = vld [vmem:[%s8412_s8 + $0x484] ss:$16 sps:$4 sm:$0xff]  }
 0x3ef   : > { %3981 = vmatprep.subr.bf16.mxu0 %v5826_v52  ;;  %4022 = vmatprep.subr.bf16.mxu1 %v5829_v54  ;;  %v5901_v51 = vld [vmem:[%s8412_s8 + $0x684] ss:$16 sps:$4 sm:$0xff]   ;;  %v5896_v52 = vld [vmem:[%s8412_s8 + $0x480] ss:$16 sps:$4 sm:$0xff]  }
 0x3f0   : > { %v5899_v54 = vld [vmem:[%s8412_s8 + $0x680] ss:$16 sps:$4 sm:$0xff]  }
 0x3f2   : > { %3982 = vmatpush1.bf16.msra.mxu0 %v5824_v55  ;;  %4023 = vmatpush1.bf16.msra.mxu1 %v5827_v56  ;;  %v5904_v55 = vld [vmem:[%s8412_s8 + $0x464] ss:$16 sps:$4 sm:$0xff]  }
 0x3f3   : > { %3983 = vmatprep.subr.bf16.mxu0 %v5832_v58  ;;  %4024 = vmatprep.subr.bf16.mxu1 %v5835_v59  ;;  %v5907_v56 = vld [vmem:[%s8412_s8 + $0x664] ss:$16 sps:$4 sm:$0xff]   ;;  %v5902_v58 = vld [vmem:[%s8412_s8 + $0x460] ss:$16 sps:$4 sm:$0xff]  }
 0x3f4   : > { %v5905_v59 = vld [vmem:[%s8412_s8 + $0x660] ss:$16 sps:$4 sm:$0xff]  }
 0x3f6   : > { %3984 = vmatpush2.bf16.msra.mxu0 %v5830_v60  ;;  %4025 = vmatpush2.bf16.msra.mxu1 %v5833_v61  ;;  %v5910_v60 = vld [vmem:[%s8412_s8 + $0x444] ss:$16 sps:$4 sm:$0xff]  }
 0x3f7   : > { %3985 = vmatprep.subr.bf16.mxu0 %v5838_v0  ;;  %4026 = vmatprep.subr.bf16.mxu1 %v5841_v1  ;;  %v5913_v61 = vld [vmem:[%s8412_s8 + $0x644] ss:$16 sps:$4 sm:$0xff]   ;;  %v5908_v0 = vld [vmem:[%s8412_s8 + $0x440] ss:$16 sps:$4 sm:$0xff]  }
 0x3f8   : > { %v5911_v1 = vld [vmem:[%s8412_s8 + $0x640] ss:$16 sps:$4 sm:$0xff]  }
 0x3fa   : > { %3986 = vmatpush2.bf16.msra.mxu0 %v5836_v2  ;;  %4027 = vmatpush2.bf16.msra.mxu1 %v5839_v3  ;;  %v5916_v2 = vld [vmem:[%s8412_s8 + $0x424] ss:$16 sps:$4 sm:$0xff]  }
 0x3fb   : > { %3987 = vmatprep.subr.bf16.mxu0 %v5844_v4  ;;  %4028 = vmatprep.subr.bf16.mxu1 %v5847_v5  ;;  %v5919_v3 = vld [vmem:[%s8412_s8 + $0x624] ss:$16 sps:$4 sm:$0xff]   ;;  %v5914_v4 = vld [vmem:[%s8412_s8 + $0x420] ss:$16 sps:$4 sm:$0xff]  }
 0x3fc   : > { %v5917_v5 = vld [vmem:[%s8412_s8 + $0x620] ss:$16 sps:$4 sm:$0xff]  }
 0x3fe   : > { %3988 = vmatpush2.bf16.msra.mxu0 %v5842_v6  ;;  %4029 = vmatpush2.bf16.msra.mxu1 %v5845_v7  ;;  %v5922_v6 = vld [vmem:[%s8412_s8 + $0x404] ss:$16 sps:$4 sm:$0xff]  }
 0x3ff   : > { %3989 = vmatprep.subr.bf16.mxu0 %v5850_v8  ;;  %4030 = vmatprep.subr.bf16.mxu1 %v5853_v9  ;;  %v5925_v7 = vld [vmem:[%s8412_s8 + $0x604] ss:$16 sps:$4 sm:$0xff]   ;;  %v5920_v8 = vld [vmem:[%s8412_s8 + $0x400] ss:$16 sps:$4 sm:$0xff]  }
 0x400   : > { %v5923_v9 = vld [vmem:[%s8412_s8 + $0x600] ss:$16 sps:$4 sm:$0xff]  }
 0x402   : > { %3990 = vmatpush2.bf16.msra.mxu0 %v5848_v11  ;;  %4031 = vmatpush2.bf16.msra.mxu1 %v5851_v12  ;;  %v5928_v11 = vld [vmem:[%s8412_s8 + $0x5e4] ss:$16 sps:$4 sm:$0xff]  }
 0x403   : > { %3991 = vmatprep.subr.bf16.mxu0 %v5856_v13  ;;  %4032 = vmatprep.subr.bf16.mxu1 %v5859_v14  ;;  %v5931_v12 = vld [vmem:[%s8412_s8 + $0x7e4] ss:$16 sps:$4 sm:$0xff]   ;;  %v5926_v13 = vld [vmem:[%s8412_s8 + $0x5e0] ss:$16 sps:$4 sm:$0xff]  }
 0x404   : > { %v5929_v14 = vld [vmem:[%s8412_s8 + $0x7e0] ss:$16 sps:$4 sm:$0xff]  }
 0x406   : > { %3992 = vmatpush2.bf16.msra.mxu0 %v5854_v17  ;;  %4033 = vmatpush2.bf16.msra.mxu1 %v5857_v18  ;;  %v5934_v17 = vld [vmem:[%s8412_s8 + $0x5c4] ss:$16 sps:$4 sm:$0xff]  }
 0x407   : > { %3993 = vmatprep.subr.bf16.mxu0 %v5862_v19  ;;  %4034 = vmatprep.subr.bf16.mxu1 %v5865_v57  ;;  %v5937_v18 = vld [vmem:[%s8412_s8 + $0x7c4] ss:$16 sps:$4 sm:$0xff]   ;;  %v5932_v19 = vld [vmem:[%s8412_s8 + $0x5c0] ss:$16 sps:$4 sm:$0xff]  }
 0x408   : > { %v5935_v57 = vld [vmem:[%s8412_s8 + $0x7c0] ss:$16 sps:$4 sm:$0xff]  }
 0x40a   : > { %3994 = vmatpush2.bf16.msra.mxu0 %v5860_v23  ;;  %4035 = vmatpush2.bf16.msra.mxu1 %v5863_v24  ;;  %v5938_v23 = vld [vmem:[%s8412_s8 + $0x5a0] ss:$16 sps:$4 sm:$0xff]  }
 0x40b   : > { %3995 = vmatprep.subr.bf16.mxu0 %v5868_v25  ;;  %4036 = vmatprep.subr.bf16.mxu1 %v5871_v63  ;;  %v5941_v24 = vld [vmem:[%s8412_s8 + $0x7a0] ss:$16 sps:$4 sm:$0xff]   ;;  %v5946_v25 = vld [vmem:[%s8412_s8 + $0x584] ss:$16 sps:$4 sm:$0xff]  }
 0x40c   : > { %v5949_v63 = vld [vmem:[%s8412_s8 + $0x784] ss:$16 sps:$4 sm:$0xff]  }
 0x40e   : > { %3996 = vmatpush2.bf16.msra.mxu0 %v5866_v28  ;;  %4037 = vmatpush2.bf16.msra.mxu1 %v5869_v29  ;;  %v5952_v28 = vld [vmem:[%s8412_s8 + $0x564] ss:$16 sps:$4 sm:$0xff]  }
 0x40f   : > { %3997 = vmatprep.subr.bf16.mxu0 %v5874_v30  ;;  %4038 = vmatprep.subr.bf16.mxu1 %v5877_v32  ;;  %v5955_v29 = vld [vmem:[%s8412_s8 + $0x764] ss:$16 sps:$4 sm:$0xff]   ;;  %v5950_v30 = vld [vmem:[%s8412_s8 + $0x560] ss:$16 sps:$4 sm:$0xff]  }
 0x410   : > { %v5953_v32 = vld [vmem:[%s8412_s8 + $0x760] ss:$16 sps:$4 sm:$0xff]  }
 0x412   : > { %3998 = vmatpush2.bf16.msra.mxu0 %v5872_v35  ;;  %4039 = vmatpush2.bf16.msra.mxu1 %v5875_v36  ;;  %v5956_v35 = vld [vmem:[%s8412_s8 + $0x540] ss:$16 sps:$4 sm:$0xff]  }
 0x413   : > { %4049 = vmatprep.subr.bf16.mxu0 %v5880_v37  ;;  %4090 = vmatprep.subr.bf16.mxu1 %v5883_v38  ;;  %v5959_v36 = vld [vmem:[%s8412_s8 + $0x740] ss:$16 sps:$4 sm:$0xff]   ;;  %v5964_v37 = vld [vmem:[%s8412_s8 + $0x524] ss:$16 sps:$4 sm:$0xff]  }
 0x414   : > { %v5967_v38 = vld [vmem:[%s8412_s8 + $0x724] ss:$16 sps:$4 sm:$0xff]  }
 0x415   : > { %4000 = vmatmul.mubr.bf16.vlgmr.msra.gmra.mxu0 %v7242_v39  ;;  %4041 = vmatmul.mubr.bf16.vlgmr.msra.gmra.mxu1 %v7244_v40 }
 0x416   : > { %4050 = vmatpush1.bf16.msra.mxu0 %v5878_v41  ;;  %4091 = vmatpush1.bf16.msra.mxu1 %v5881_v42  ;;  %v5962_v41 = vld [vmem:[%s8412_s8 + $0x520] ss:$16 sps:$4 sm:$0xff]  }
 0x417   : > { %4051 = vmatprep.subr.bf16.mxu0 %v5886_v43  ;;  %4092 = vmatprep.subr.bf16.mxu1 %v5889_v44  ;;  %v5965_v42 = vld [vmem:[%s8412_s8 + $0x720] ss:$16 sps:$4 sm:$0xff]   ;;  %v5970_v43 = vld [vmem:[%s8412_s8 + $0x504] ss:$16 sps:$4 sm:$0xff]  }
 0x418   : > { %v5973_v44 = vld [vmem:[%s8412_s8 + $0x704] ss:$16 sps:$4 sm:$0xff]  }
 0x41a   : > { %4052 = vmatpush1.bf16.msra.mxu0 %v5884_v45  ;;  %4093 = vmatpush1.bf16.msra.mxu1 %v5887_v46  ;;  %v5968_v45 = vld [vmem:[%s8412_s8 + $0x500] ss:$16 sps:$4 sm:$0xff]  }
 0x41b   : > { %4053 = vmatprep.subr.bf16.mxu0 %v5892_v47  ;;  %4094 = vmatprep.subr.bf16.mxu1 %v5895_v48  ;;  %v5971_v46 = vld [vmem:[%s8412_s8 + $0x700] ss:$16 sps:$4 sm:$0xff]   ;;  %v5976_v47 = vld [vmem:[%s8412_s8 + $0x8e4] ss:$16 sps:$4 sm:$0xff]  }
 0x41c   : > { %v5979_v48 = vld [vmem:[%s8412_s8 + $0xae4] ss:$16 sps:$4 sm:$0xff]  }
 0x41e   : > { %4054 = vmatpush1.bf16.msra.mxu0 %v5890_v49  ;;  %4095 = vmatpush1.bf16.msra.mxu1 %v5893_v50  ;;  %v4974_v49 = vld [vmem:[%s8411_s7 + $0x1] ss:$4 sm:$0xf] }
 0x41f   : > { %4055 = vmatprep.subr.bf16.mxu0 %v5898_v33  ;;  %4096 = vmatprep.subr.bf16.mxu1 %v5901_v51  ;;  %v1062_v50 = vrot.slane %v4974_v49, %v7183_v15  ;;  %v1070_v33 = vrot.slane %v4974_v49, %v7186_v16  ;;  %v1066_v51 = vrot.slane %v4974_v49, %v6977_v62 }
 0x422   : > { %4056 = vmatpush1.bf16.msra.mxu0 %v5896_v52  ;;  %4097 = vmatpush1.bf16.msra.mxu1 %v5899_v54  ;;  %v1074_v52 = vrot.slane %v4974_v49, %v7012_v10 }
 0x423   : > { %4057 = vmatprep.subr.bf16.mxu0 %v5904_v55  ;;  %4098 = vmatprep.subr.bf16.mxu1 %v5907_v56 }
 0x426   : > { %4058 = vmatpush1.bf16.msra.mxu0 %v5902_v58  ;;  %4099 = vmatpush1.bf16.msra.mxu1 %v5905_v59 }
 0x427   : > { %4059 = vmatprep.subr.bf16.mxu0 %v5910_v60  ;;  %4100 = vmatprep.subr.bf16.mxu1 %v5913_v61 }
 0x42a   : > { %4060 = vmatpush1.bf16.msra.mxu0 %v5908_v0  ;;  %4101 = vmatpush1.bf16.msra.mxu1 %v5911_v1 }
 0x42b   : > { %4061 = vmatprep.subr.bf16.mxu0 %v5916_v2  ;;  %4102 = vmatprep.subr.bf16.mxu1 %v5919_v3 }
 0x42e   : > { %4062 = vmatpush1.bf16.msra.mxu0 %v5914_v4  ;;  %4103 = vmatpush1.bf16.msra.mxu1 %v5917_v5 }
 0x42f   : > { %4063 = vmatprep.subr.bf16.mxu0 %v5922_v6  ;;  %4104 = vmatprep.subr.bf16.mxu1 %v5925_v7 }
 0x432   : > { %4064 = vmatpush1.bf16.msra.mxu0 %v5920_v8  ;;  %4105 = vmatpush1.bf16.msra.mxu1 %v5923_v9 }
 0x433   : > { %4065 = vmatprep.subr.bf16.mxu0 %v5928_v11  ;;  %4106 = vmatprep.subr.bf16.mxu1 %v5931_v12  ;;  %v5974_v12 = vld [vmem:[%s8412_s8 + $0x8e0] ss:$16 sps:$4 sm:$0xff]  }
 0x436   : > { %4066 = vmatpush2.bf16.msra.mxu0 %v5926_v13  ;;  %4107 = vmatpush2.bf16.msra.mxu1 %v5929_v14  ;;  %v5977_v13 = vld [vmem:[%s8412_s8 + $0xae0] ss:$16 sps:$4 sm:$0xff]  }
 0x437   : > { %4067 = vmatprep.subr.bf16.mxu0 %v5934_v17  ;;  %4108 = vmatprep.subr.bf16.mxu1 %v5937_v18  ;;  %v5982_v18 = vld [vmem:[%s8412_s8 + $0x8c4] ss:$16 sps:$4 sm:$0xff]  }
 0x43a   : > { %4068 = vmatpush2.bf16.msra.mxu0 %v5932_v19  ;;  %4109 = vmatpush2.bf16.msra.mxu1 %v5935_v57  ;;  %v5985_v19 = vld [vmem:[%s8412_s8 + $0xac4] ss:$16 sps:$4 sm:$0xff]   ;;  %v5980_v57 = vld [vmem:[%s8412_s8 + $0x8c0] ss:$16 sps:$4 sm:$0xff]  }
 0x43b   : > { %4069 = vmatprep.subr.bf16.mxu0 %v5940_v53  ;;  %4110 = vmatprep.subr.bf16.mxu1 %v5943_v21  ;;  %v5983_v53 = vld [vmem:[%s8412_s8 + $0xac0] ss:$16 sps:$4 sm:$0xff]   ;;  %v5988_v21 = vld [vmem:[%s8412_s8 + $0x8a4] ss:$16 sps:$4 sm:$0xff]  }
 0x43e   : > { %4070 = vmatpush2.bf16.msra.mxu0 %v5938_v23  ;;  %4111 = vmatpush2.bf16.msra.mxu1 %v5941_v24  ;;  %v5991_v23 = vld [vmem:[%s8412_s8 + $0xaa4] ss:$16 sps:$4 sm:$0xff]   ;;  %v5986_v24 = vld [vmem:[%s8412_s8 + $0x8a0] ss:$16 sps:$4 sm:$0xff]  }
 0x43f   : > { %4071 = vmatprep.subr.bf16.mxu0 %v5946_v25  ;;  %4112 = vmatprep.subr.bf16.mxu1 %v5949_v63  ;;  %v5989_v25 = vld [vmem:[%s8412_s8 + $0xaa0] ss:$16 sps:$4 sm:$0xff]   ;;  %v5994_v63 = vld [vmem:[%s8412_s8 + $0x884] ss:$16 sps:$4 sm:$0xff]  }
 0x442   : > { %4072 = vmatpush2.bf16.msra.mxu0 %v5944_v26  ;;  %4113 = vmatpush2.bf16.msra.mxu1 %v5947_v27  ;;  %v5997_v26 = vld [vmem:[%s8412_s8 + $0xa84] ss:$16 sps:$4 sm:$0xff]   ;;  %v5992_v27 = vld [vmem:[%s8412_s8 + $0x880] ss:$16 sps:$4 sm:$0xff]  }
 0x443   : > { %4073 = vmatprep.subr.bf16.mxu0 %v5952_v28  ;;  %4114 = vmatprep.subr.bf16.mxu1 %v5955_v29  ;;  %v5995_v28 = vld [vmem:[%s8412_s8 + $0xa80] ss:$16 sps:$4 sm:$0xff]   ;;  %v6000_v29 = vld [vmem:[%s8412_s8 + $0x864] ss:$16 sps:$4 sm:$0xff]  }
 0x446   : > { %4074 = vmatpush2.bf16.msra.mxu0 %v5950_v30  ;;  %4115 = vmatpush2.bf16.msra.mxu1 %v5953_v32  ;;  %v6003_v30 = vld [vmem:[%s8412_s8 + $0xa64] ss:$16 sps:$4 sm:$0xff]   ;;  %v5998_v32 = vld [vmem:[%s8412_s8 + $0x860] ss:$16 sps:$4 sm:$0xff]  }
 0x447   : > { %4075 = vmatprep.subr.bf16.mxu0 %v5958_v20  ;;  %4116 = vmatprep.subr.bf16.mxu1 %v5961_v31  ;;  %v6001_v20 = vld [vmem:[%s8412_s8 + $0xa60] ss:$16 sps:$4 sm:$0xff]   ;;  %v6006_v31 = vld [vmem:[%s8412_s8 + $0x844] ss:$16 sps:$4 sm:$0xff]  }
 0x44a   : > { %4076 = vmatpush2.bf16.msra.mxu0 %v5956_v35  ;;  %4117 = vmatpush2.bf16.msra.mxu1 %v5959_v36  ;;  %v6009_v35 = vld [vmem:[%s8412_s8 + $0xa44] ss:$16 sps:$4 sm:$0xff]   ;;  %v6004_v36 = vld [vmem:[%s8412_s8 + $0x840] ss:$16 sps:$4 sm:$0xff]  }
 0x44b   : > { %4077 = vmatprep.subr.bf16.mxu0 %v5964_v37  ;;  %4118 = vmatprep.subr.bf16.mxu1 %v5967_v38  ;;  %v6007_v37 = vld [vmem:[%s8412_s8 + $0xa40] ss:$16 sps:$4 sm:$0xff]   ;;  %v6012_v38 = vld [vmem:[%s8412_s8 + $0x824] ss:$16 sps:$4 sm:$0xff]  }
 0x44e   : > { %4078 = vmatpush2.bf16.msra.mxu0 %v5962_v41  ;;  %4119 = vmatpush2.bf16.msra.mxu1 %v5965_v42  ;;  %v6015_v41 = vld [vmem:[%s8412_s8 + $0xa24] ss:$16 sps:$4 sm:$0xff]  }
 0x44f   : > { %4079 = vmatprep.subr.bf16.mxu0 %v5970_v43  ;;  %4120 = vmatprep.subr.bf16.mxu1 %v5973_v44  ;;  %v7534_v42 = vld [vmem:[%s8411_s7 + $0x2] ss:$4 sm:$0xf] }
 0x450   : > { %v6010_v43 = vld [vmem:[%s8412_s8 + $0x820] ss:$16 sps:$4 sm:$0xff]  }
 0x451   : > { %v6013_v44 = vld [vmem:[%s8412_s8 + $0xa20] ss:$16 sps:$4 sm:$0xff]  }
 0x452   : > { %4080 = vmatpush2.bf16.msra.mxu0 %v5968_v45  ;;  %4121 = vmatpush2.bf16.msra.mxu1 %v5971_v46  ;;  %v1369_v45 = vrot.slane %v7534_v42, %v6977_v62  ;;  %v1377_v46 = vrot.slane %v7534_v42, %v7012_v10 }
 0x453   : > { %4131 = vmatprep.subr.bf16.mxu0 %v5976_v47  ;;  %4172 = vmatprep.subr.bf16.mxu1 %v5979_v48  ;;  %v6018_v47 = vld [vmem:[%s8412_s8 + $0x804] ss:$16 sps:$4 sm:$0xff]  }
 0x454   : > { %v6021_v48 = vld [vmem:[%s8412_s8 + $0xa04] ss:$16 sps:$4 sm:$0xff]  }
 0x475   : > { %v1273_v54 = vpop.f32.mrf.mxu0  ;;  %v1314_v55 = vpop.f32.mrf.mxu1 }
 0x476   : > { %v1274_v56 = vadd.f32 %v1273_v54, %v1062_v50  ;;  %v1315_v58 = vadd.f32 %v1314_v55, %v1070_v33  ;;  %v6019_v54 = vld [vmem:[%s8412_s8 + $0xa00] ss:$16 sps:$4 sm:$0xff]  }
 0x477   : > { %v1275_v59 = vpop.f32.mrf.mxu0  ;;  %v1316_v60 = vpop.f32.mrf.mxu1 }
 0x478   : > { %v1276_v61 = vadd.f32 %v1275_v59, %v1066_v51  ;;  %v1317_v0 = vadd.f32 %v1316_v60, %v1074_v52  ;;  %v1321_v1 = vmax.f32 %v1274_v56, 0.0  ;;  %v1323_v2 = vmax.f32 %v1315_v58, 0.0  ;;  %v6016_v52 = vld [vmem:[%s8412_s8 + $0x800] ss:$16 sps:$4 sm:$0xff]   ;;  %v6024_v58 = vld [vmem:[%s8412_s8 + $0x9e4] ss:$16 sps:$4 sm:$0xff]  }
 0x479   : > { %v1277_v3 = vpop.f32.mrf.mxu0  ;;  %v1318_v4 = vpop.f32.mrf.mxu1  ;;  %v6027_v59 = vld [vmem:[%s8412_s8 + $0xbe4] ss:$16 sps:$4 sm:$0xff]  }
 0x47a   : > { %v1322_v5 = vmax.f32 %v1276_v61, 0.0  ;;  %v1324_v6 = vmax.f32 %v1317_v0, 0.0  ;;  %v7457_v14 = vpack.c.bf16 %v1321_v1, %v1321_v1  ;;  %v7459_v17 = vpack.c.bf16 %v1323_v2, %v1323_v2  ;;  %v6022_v4 = vld [vmem:[%s8412_s8 + $0x9e0] ss:$16 sps:$4 sm:$0xff]  }
 0x47b   : > { %v1278_v7 = vpop.f32.mrf.mxu0  ;;  %v1319_v8 = vpop.f32.mrf.mxu1 }
 0x47c   : > { %v7447_v9 = vpack.c.bf16 %v1322_v5, %v1322_v5  ;;  %v7449_v11 = vpack.c.bf16 %v1324_v6, %v1324_v6  ;;  %v6025_v5 = vld [vmem:[%s8412_s8 + $0xbe0] ss:$16 sps:$4 sm:$0xff]   ;;  %v6030_v8 = vld [vmem:[%s8412_s8 + $0x9c4] ss:$16 sps:$4 sm:$0xff]  }
 0x47e   : > { %4081 = vmatprep.mubr.bf16.mxu0 %v7447_v9  ;;  %4122 = vmatprep.mubr.bf16.mxu1 %v7449_v11 }
 0x47f   : > { %4082 = vmatmul.mubr.bf16.vlgmr.msra.gmra.mxu0 %v7457_v14  ;;  %4123 = vmatmul.mubr.bf16.vlgmr.msra.gmra.mxu1 %v7459_v17 }
 0x480   : > { %4132 = vmatpush1.bf16.msra.mxu0 %v5974_v12  ;;  %4173 = vmatpush1.bf16.msra.mxu1 %v5977_v13  ;;  %v6033_v12 = vld [vmem:[%s8412_s8 + $0xbc4] ss:$16 sps:$4 sm:$0xff]   ;;  %v6028_v13 = vld [vmem:[%s8412_s8 + $0x9c0] ss:$16 sps:$4 sm:$0xff]  }
 0x481   : > { %4133 = vmatprep.subr.bf16.mxu0 %v5982_v18  ;;  %4174 = vmatprep.subr.bf16.mxu1 %v5985_v19  ;;  %v6031_v18 = vld [vmem:[%s8412_s8 + $0xbc0] ss:$16 sps:$4 sm:$0xff]   ;;  %v6036_v19 = vld [vmem:[%s8412_s8 + $0x9a4] ss:$16 sps:$4 sm:$0xff]  }
 0x484   : > { %4134 = vmatpush1.bf16.msra.mxu0 %v5980_v57  ;;  %4175 = vmatpush1.bf16.msra.mxu1 %v5983_v53  ;;  %v6039_v57 = vld [vmem:[%s8412_s8 + $0xba4] ss:$16 sps:$4 sm:$0xff]   ;;  %v6034_v53 = vld [vmem:[%s8412_s8 + $0x9a0] ss:$16 sps:$4 sm:$0xff]  }
 0x485   : > { %4135 = vmatprep.subr.bf16.mxu0 %v5988_v21  ;;  %4176 = vmatprep.subr.bf16.mxu1 %v5991_v23  ;;  %v6037_v21 = vld [vmem:[%s8412_s8 + $0xba0] ss:$16 sps:$4 sm:$0xff]   ;;  %v6042_v23 = vld [vmem:[%s8412_s8 + $0x984] ss:$16 sps:$4 sm:$0xff]  }
 0x488   : > { %4136 = vmatpush1.bf16.msra.mxu0 %v5986_v24  ;;  %4177 = vmatpush1.bf16.msra.mxu1 %v5989_v25  ;;  %v6045_v24 = vld [vmem:[%s8412_s8 + $0xb84] ss:$16 sps:$4 sm:$0xff]   ;;  %v6040_v25 = vld [vmem:[%s8412_s8 + $0x980] ss:$16 sps:$4 sm:$0xff]  }
 0x489   : > { %4137 = vmatprep.subr.bf16.mxu0 %v5994_v63  ;;  %4178 = vmatprep.subr.bf16.mxu1 %v5997_v26  ;;  %v6043_v63 = vld [vmem:[%s8412_s8 + $0xb80] ss:$16 sps:$4 sm:$0xff]   ;;  %v6048_v26 = vld [vmem:[%s8412_s8 + $0x964] ss:$16 sps:$4 sm:$0xff]  }
 0x48c   : > { %4138 = vmatpush1.bf16.msra.mxu0 %v5992_v27  ;;  %4179 = vmatpush1.bf16.msra.mxu1 %v5995_v28  ;;  %v6051_v27 = vld [vmem:[%s8412_s8 + $0xb64] ss:$16 sps:$4 sm:$0xff]   ;;  %v6046_v28 = vld [vmem:[%s8412_s8 + $0x960] ss:$16 sps:$4 sm:$0xff]  }
 0x48d   : > { %4139 = vmatprep.subr.bf16.mxu0 %v6000_v29  ;;  %4180 = vmatprep.subr.bf16.mxu1 %v6003_v30  ;;  %v6049_v29 = vld [vmem:[%s8412_s8 + $0xb60] ss:$16 sps:$4 sm:$0xff]   ;;  %v6054_v30 = vld [vmem:[%s8412_s8 + $0x944] ss:$16 sps:$4 sm:$0xff]  }
 0x490   : > { %4140 = vmatpush1.bf16.msra.mxu0 %v5998_v32  ;;  %4181 = vmatpush1.bf16.msra.mxu1 %v6001_v20  ;;  %v6057_v32 = vld [vmem:[%s8412_s8 + $0xb44] ss:$16 sps:$4 sm:$0xff]   ;;  %v1373_v20 = vrot.slane %v7534_v42, %v7186_v16 }
 0x491   : > { %4141 = vmatprep.subr.bf16.mxu0 %v6006_v31  ;;  %4182 = vmatprep.subr.bf16.mxu1 %v6009_v35  ;;  %v6052_v31 = vld [vmem:[%s8412_s8 + $0x940] ss:$16 sps:$4 sm:$0xff]  }
 0x492   : > { %v6055_v35 = vld [vmem:[%s8412_s8 + $0xb40] ss:$16 sps:$4 sm:$0xff]  }
 0x494   : > { %4142 = vmatpush1.bf16.msra.mxu0 %v6004_v36  ;;  %4183 = vmatpush1.bf16.msra.mxu1 %v6007_v37  ;;  %v1365_v36 = vrot.slane %v7534_v42, %v7183_v15  ;;  %v6060_v37 = vld [vmem:[%s8412_s8 + $0x924] ss:$16 sps:$4 sm:$0xff]   ;;  %v6061_v42 = vld [vmem:[%s8412_s8 + $0xb20] ss:$16 sps:$4 sm:$0xff]  }
 0x495   : > { %4143 = vmatprep.subr.bf16.mxu0 %v6012_v38  ;;  %4184 = vmatprep.subr.bf16.mxu1 %v6015_v41  ;;  %v7552_v49 = vpop.f32.mrf.mxu0  ;;  %v7554_v50 = vpop.f32.mrf.mxu1  ;;  %v6063_v38 = vld [vmem:[%s8412_s8 + $0xb24] ss:$16 sps:$4 sm:$0xff]  }
 0x496   : > { %v1618_v41 = vadd.f32 %v7554_v50, %v1373_v20 }
 0x497   : > { %v1578_v33 = vpop.f32.mrf.mxu0  ;;  %v1619_v51 = vpop.f32.mrf.mxu1 }
 0x498   : > { %4144 = vmatpush1.bf16.msra.mxu0 %v6010_v43  ;;  %4185 = vmatpush1.bf16.msra.mxu1 %v6013_v44  ;;  %v1579_v55 = vadd.f32 %v1578_v33, %v1369_v45  ;;  %v1620_v56 = vadd.f32 %v1619_v51, %v1377_v46  ;;  %v6058_v43 = vld [vmem:[%s8412_s8 + $0x920] ss:$16 sps:$4 sm:$0xff]   ;;  %v1577_v44 = vadd.f32 %v7552_v49, %v1365_v36  ;;  %v6066_v45 = vld [vmem:[%s8412_s8 + $0x904] ss:$16 sps:$4 sm:$0xff]   ;;  %v6072_v33 = vld [vmem:[%s8412_s8 + $0xec] ss:$16 sps:$4 sm:$0xff]  }
 0x499   : > { %4145 = vmatprep.subr.bf16.mxu0 %v6018_v47  ;;  %4186 = vmatprep.subr.bf16.mxu1 %v6021_v48  ;;  %v1580_v60 = vpop.f32.mrf.mxu0  ;;  %v1621_v61 = vpop.f32.mrf.mxu1  ;;  %v6069_v46 = vld [vmem:[%s8412_s8 + $0xb04] ss:$16 sps:$4 sm:$0xff]   ;;  %v1626_v47 = vmax.f32 %v1618_v41, 0.0  ;;  %v6064_v48 = vld [vmem:[%s8412_s8 + $0x900] ss:$16 sps:$4 sm:$0xff]  }
 0x49a   : > { %v1625_v0 = vmax.f32 %v1579_v55, 0.0  ;;  %v1627_v1 = vmax.f32 %v1620_v56, 0.0  ;;  %v6067_v49 = vld [vmem:[%s8412_s8 + $0xb00] ss:$16 sps:$4 sm:$0xff]   ;;  %v1624_v50 = vmax.f32 %v1577_v44, 0.0 }
 0x49b   : > { %v1581_v2 = vpop.f32.mrf.mxu0  ;;  %v1622_v3 = vpop.f32.mrf.mxu1  ;;  %v6075_v51 = vld [vmem:[%s8412_s8 + $0x2ec] ss:$16 sps:$4 sm:$0xff]   ;;  %v6073_v56 = vld [vmem:[%s8412_s8 + $0x2e8] ss:$16 sps:$4 sm:$0xff]  }
 0x49c   : > { %4146 = vmatpush1.bf16.msra.mxu0 %v6016_v52  ;;  %4187 = vmatpush1.bf16.msra.mxu1 %v6019_v54  ;;  %v7574_v6 = vpack.c.bf16 %v1625_v0, %v1625_v0  ;;  %v7576_v7 = vpack.c.bf16 %v1627_v1, %v1627_v1  ;;  %v7676_v52 = vpack.c.bf16 %v1626_v47, %v1626_v47  ;;  %v6070_v54 = vld [vmem:[%s8412_s8 + $0xe8] ss:$16 sps:$4 sm:$0xff]   ;;  %v6084_v0 = vld [vmem:[%s8412_s8 + $0xac] ss:$16 sps:$4 sm:$0xff]  }
 0x49d   : > { %4147 = vmatprep.subr.bf16.mxu0 %v6024_v58  ;;  %4188 = vmatprep.subr.bf16.mxu1 %v6027_v59  ;;  %v7681_v55 = vpack.c.bf16 %v1624_v50, %v1624_v50  ;;  %v6078_v58 = vld [vmem:[%s8412_s8 + $0xcc] ss:$16 sps:$4 sm:$0xff]   ;;  %v6076_v60 = vld [vmem:[%s8412_s8 + $0xc8] ss:$16 sps:$4 sm:$0xff]  }
 0x49e   : > { %4163 = vmatprep.mubr.bf16.mxu0 %v7574_v6  ;;  %4204 = vmatprep.mubr.bf16.mxu1 %v7576_v7  ;;  %v6081_v59 = vld [vmem:[%s8412_s8 + $0x2cc] ss:$16 sps:$4 sm:$0xff]   ;;  %v6079_v61 = vld [vmem:[%s8412_s8 + $0x2c8] ss:$16 sps:$4 sm:$0xff]  }
 0x49f   : > { %v6082_v1 = vld [vmem:[%s8412_s8 + $0xa8] ss:$16 sps:$4 sm:$0xff]   ;;  %v6090_v2 = vld [vmem:[%s8412_s8 + $0x8c] ss:$16 sps:$4 sm:$0xff]  }
 0x4a0   : > { %4148 = vmatpush2.bf16.msra.mxu0 %v6022_v4  ;;  %4189 = vmatpush2.bf16.msra.mxu1 %v6025_v5  ;;  %v6093_v3 = vld [vmem:[%s8412_s8 + $0x28c] ss:$16 sps:$4 sm:$0xff]   ;;  %v6088_v4 = vld [vmem:[%s8412_s8 + $0x88] ss:$16 sps:$4 sm:$0xff]  }
 0x4a1   : > { %4149 = vmatprep.subr.bf16.mxu0 %v6030_v8  ;;  %4190 = vmatprep.subr.bf16.mxu1 %v6033_v12  ;;  %v6091_v5 = vld [vmem:[%s8412_s8 + $0x288] ss:$16 sps:$4 sm:$0xff]   ;;  %v6096_v8 = vld [vmem:[%s8412_s8 + $0x6c] ss:$16 sps:$4 sm:$0xff]  }
 0x4a2   : > { %v6099_v12 = vld [vmem:[%s8412_s8 + $0x26c] ss:$16 sps:$4 sm:$0xff]  }
 0x4a3   : > { %v6120_v41 = vld [vmem:[%s8412_s8 + $0x1ec] ss:$16 sps:$4 sm:$0xff]  }
 0x4a4   : > { %4150 = vmatpush2.bf16.msra.mxu0 %v6028_v13  ;;  %4191 = vmatpush2.bf16.msra.mxu1 %v6031_v18  ;;  %v6094_v13 = vld [vmem:[%s8412_s8 + $0x68] ss:$16 sps:$4 sm:$0xff]   ;;  %v6123_v44 = vld [vmem:[%s8412_s8 + $0x3ec] ss:$16 sps:$4 sm:$0xff]  }
 0x4a5   : > { %4151 = vmatprep.subr.bf16.mxu0 %v6036_v19  ;;  %4192 = vmatprep.subr.bf16.mxu1 %v6039_v57  ;;  %v6097_v18 = vld [vmem:[%s8412_s8 + $0x268] ss:$16 sps:$4 sm:$0xff]   ;;  %v6102_v19 = vld [vmem:[%s8412_s8 + $0x4c] ss:$16 sps:$4 sm:$0xff]  }
 0x4a6   : > { %v6105_v57 = vld [vmem:[%s8412_s8 + $0x24c] ss:$16 sps:$4 sm:$0xff]  }
 0x4a7   : > { %v6126_v50 = vld [vmem:[%s8412_s8 + $0x1cc] ss:$16 sps:$4 sm:$0xff]  }
 0x4a8   : > { %4152 = vmatpush2.bf16.msra.mxu0 %v6034_v53  ;;  %4193 = vmatpush2.bf16.msra.mxu1 %v6037_v21  ;;  %v7747_v53 = vld [vmem:[%s8411_s7 + $0x3] ss:$4 sm:$0xf] }
 0x4a9   : > { %4153 = vmatprep.subr.bf16.mxu0 %v6042_v23  ;;  %4194 = vmatprep.subr.bf16.mxu1 %v6045_v24  ;;  %v6100_v21 = vld [vmem:[%s8412_s8 + $0x48] ss:$16 sps:$4 sm:$0xff]   ;;  %v6108_v24 = vld [vmem:[%s8412_s8 + $0x2c] ss:$16 sps:$4 sm:$0xff]  }
 0x4aa   : > { %v6103_v23 = vld [vmem:[%s8412_s8 + $0x248] ss:$16 sps:$4 sm:$0xff]  }
 0x4ac   : > { %4154 = vmatpush2.bf16.msra.mxu0 %v6040_v25  ;;  %4195 = vmatpush2.bf16.msra.mxu1 %v6043_v63  ;;  %v6111_v25 = vld [vmem:[%s8412_s8 + $0x22c] ss:$16 sps:$4 sm:$0xff]   ;;  %v2030_v63 = vrot.slane %v7747_v53, %v7183_v15 }
 0x4ad   : > { %4155 = vmatprep.subr.bf16.mxu0 %v6048_v26  ;;  %4196 = vmatprep.subr.bf16.mxu1 %v6051_v27  ;;  %v6106_v26 = vld [vmem:[%s8412_s8 + $0x28] ss:$16 sps:$4 sm:$0xff]   ;;  %v2034_v27 = vrot.slane %v7747_v53, %v6977_v62 }
 0x4b0   : > { %4156 = vmatpush2.bf16.msra.mxu0 %v6046_v28  ;;  %4197 = vmatpush2.bf16.msra.mxu1 %v6049_v29  ;;  %v6109_v28 = vld [vmem:[%s8412_s8 + $0x228] ss:$16 sps:$4 sm:$0xff]   ;;  %v6114_v29 = vld [vmem:[%s8412_s8 + $0xc] ss:$16 sps:$4 sm:$0xff]  }
 0x4b1   : > { %4157 = vmatprep.subr.bf16.mxu0 %v6054_v30  ;;  %4198 = vmatprep.subr.bf16.mxu1 %v6057_v32  ;;  %v6117_v32 = vld [vmem:[%s8412_s8 + $0x20c] ss:$16 sps:$4 sm:$0xff]  }
 0x4b4   : > { %4158 = vmatpush2.bf16.msra.mxu0 %v6052_v31  ;;  %4199 = vmatpush2.bf16.msra.mxu1 %v6055_v35  ;;  %v6112_v35 = vld [vmem:[%s8412_s8 + $0x8] ss:$16 sps:$4 sm:$0xff]  }
 0x4b5   : > { %4159 = vmatprep.subr.bf16.mxu0 %v6060_v37  ;;  %4200 = vmatprep.subr.bf16.mxu1 %v6063_v38  ;;  %v6115_v38 = vld [vmem:[%s8412_s8 + $0x208] ss:$16 sps:$4 sm:$0xff]  }
 0x4b8   : > { %4160 = vmatpush2.bf16.msra.mxu0 %v6058_v43  ;;  %4201 = vmatpush2.bf16.msra.mxu1 %v6061_v42 }
 0x4b9   : > { %4161 = vmatprep.subr.bf16.mxu0 %v6066_v45  ;;  %4202 = vmatprep.subr.bf16.mxu1 %v6069_v46 }
 0x4bc   : > { %4162 = vmatpush2.bf16.msra.mxu0 %v6064_v48  ;;  %4203 = vmatpush2.bf16.msra.mxu1 %v6067_v49  ;;  %v6118_v48 = vld [vmem:[%s8412_s8 + $0x1e8] ss:$16 sps:$4 sm:$0xff]  }
 0x4bd   : > { %4213 = vmatprep.subr.bf16.mxu0 %v6072_v33  ;;  %4254 = vmatprep.subr.bf16.mxu1 %v6075_v51  ;;  %v6121_v49 = vld [vmem:[%s8412_s8 + $0x3e8] ss:$16 sps:$4 sm:$0xff]   ;;  %v6129_v33 = vld [vmem:[%s8412_s8 + $0x3cc] ss:$16 sps:$4 sm:$0xff]  }
 0x4be   : > { %v6124_v51 = vld [vmem:[%s8412_s8 + $0x1c8] ss:$16 sps:$4 sm:$0xff]  }
 0x4bf   : > { %4164 = vmatmul.mubr.bf16.vlgmr.msra.gmra.mxu0 %v7681_v55  ;;  %4205 = vmatmul.mubr.bf16.vlgmr.msra.gmra.mxu1 %v7676_v52 }
 0x4c0   : > { %4214 = vmatpush1.bf16.msra.mxu0 %v6070_v54  ;;  %4245 = vmatprep.mubr.bf16.mxu0 %v7044_v22  ;;  %v6087_v22 = vld [vmem:[%s8412_s8 + $0x2ac] ss:$16 sps:$4 sm:$0xff]   ;;  %v6127_v54 = vld [vmem:[%s8412_s8 + $0x3c8] ss:$16 sps:$4 sm:$0xff]  }
 0x4c1   : > { %4255 = vmatpush1.bf16.msra.mxu1 %v6073_v56  ;;  %4286 = vmatprep.mubr.bf16.mxu1 %v7059_v34  ;;  %v6085_v34 = vld [vmem:[%s8412_s8 + $0x2a8] ss:$16 sps:$4 sm:$0xff]   ;;  %v6132_v56 = vld [vmem:[%s8412_s8 + $0x1ac] ss:$16 sps:$4 sm:$0xff]  }
 0x4c2   : > { %4215 = vmatprep.subr.bf16.mxu0 %v6078_v58  ;;  %4256 = vmatprep.subr.bf16.mxu1 %v6081_v59  ;;  %v6135_v58 = vld [vmem:[%s8412_s8 + $0x3ac] ss:$16 sps:$4 sm:$0xff]   ;;  %v6130_v59 = vld [vmem:[%s8412_s8 + $0x1a8] ss:$16 sps:$4 sm:$0xff]  }
 0x4c4   : > { %4216 = vmatpush1.bf16.msra.mxu0 %v6076_v60  ;;  %v6133_v60 = vld [vmem:[%s8412_s8 + $0x3a8] ss:$16 sps:$4 sm:$0xff]  }
 0x4c5   : > { %4257 = vmatpush1.bf16.msra.mxu1 %v6079_v61  ;;  %4217 = vmatprep.subr.bf16.mxu0 %v6084_v0  ;;  %v6138_v61 = vld [vmem:[%s8412_s8 + $0x18c] ss:$16 sps:$4 sm:$0xff]  }
 0x4c6   : > { %4258 = vmatprep.subr.bf16.mxu1 %v6087_v22  ;;  %v6141_v0 = vld [vmem:[%s8412_s8 + $0x38c] ss:$16 sps:$4 sm:$0xff]   ;;  %v6136_v22 = vld [vmem:[%s8412_s8 + $0x188] ss:$16 sps:$4 sm:$0xff]  }
 0x4c8   : > { %4218 = vmatpush1.bf16.msra.mxu0 %v6082_v1  ;;  %v6139_v1 = vld [vmem:[%s8412_s8 + $0x388] ss:$16 sps:$4 sm:$0xff]  }
 0x4c9   : > { %4259 = vmatpush1.bf16.msra.mxu1 %v6085_v34  ;;  %4219 = vmatprep.subr.bf16.mxu0 %v6090_v2  ;;  %v6144_v34 = vld [vmem:[%s8412_s8 + $0x16c] ss:$16 sps:$4 sm:$0xff]  }
 0x4ca   : > { %4260 = vmatprep.subr.bf16.mxu1 %v6093_v3  ;;  %v6147_v2 = vld [vmem:[%s8412_s8 + $0x36c] ss:$16 sps:$4 sm:$0xff]   ;;  %v6142_v3 = vld [vmem:[%s8412_s8 + $0x168] ss:$16 sps:$4 sm:$0xff]  }
 0x4cc   : > { %4220 = vmatpush1.bf16.msra.mxu0 %v6088_v4  ;;  %v6145_v4 = vld [vmem:[%s8412_s8 + $0x368] ss:$16 sps:$4 sm:$0xff]  }
 0x4cd   : > { %4261 = vmatpush1.bf16.msra.mxu1 %v6091_v5  ;;  %4221 = vmatprep.subr.bf16.mxu0 %v6096_v8  ;;  %v6150_v5 = vld [vmem:[%s8412_s8 + $0x14c] ss:$16 sps:$4 sm:$0xff]  }
 0x4ce   : > { %4262 = vmatprep.subr.bf16.mxu1 %v6099_v12  ;;  %v6153_v8 = vld [vmem:[%s8412_s8 + $0x34c] ss:$16 sps:$4 sm:$0xff]   ;;  %v6148_v12 = vld [vmem:[%s8412_s8 + $0x148] ss:$16 sps:$4 sm:$0xff]  }
 0x4d0   : > { %4222 = vmatpush1.bf16.msra.mxu0 %v6094_v13  ;;  %v6151_v13 = vld [vmem:[%s8412_s8 + $0x348] ss:$16 sps:$4 sm:$0xff]  }
 0x4d1   : > { %4263 = vmatpush1.bf16.msra.mxu1 %v6097_v18  ;;  %4223 = vmatprep.subr.bf16.mxu0 %v6102_v19  ;;  %v6156_v18 = vld [vmem:[%s8412_s8 + $0x12c] ss:$16 sps:$4 sm:$0xff]  }
 0x4d2   : > { %4264 = vmatprep.subr.bf16.mxu1 %v6105_v57  ;;  %v6159_v19 = vld [vmem:[%s8412_s8 + $0x32c] ss:$16 sps:$4 sm:$0xff]   ;;  %v6154_v57 = vld [vmem:[%s8412_s8 + $0x128] ss:$16 sps:$4 sm:$0xff]  }
 0x4d4   : > { %4224 = vmatpush1.bf16.msra.mxu0 %v6100_v21  ;;  %v6157_v21 = vld [vmem:[%s8412_s8 + $0x328] ss:$16 sps:$4 sm:$0xff]  }
 0x4d5   : > { %4265 = vmatpush1.bf16.msra.mxu1 %v6103_v23  ;;  %4225 = vmatprep.subr.bf16.mxu0 %v6108_v24  ;;  %v4001_v30 = vpop.f32.mrf.mxu0  ;;  %v4042_v15 = vpop.f32.mrf.mxu1  ;;  %v6162_v23 = vld [vmem:[%s8412_s8 + $0x10c] ss:$16 sps:$4 sm:$0xff]  }
 0x4d6   : > { %4266 = vmatprep.subr.bf16.mxu1 %v6111_v25  ;;  %v4002_v20 = vadd.f32 %v4001_v30, %v2030_v63  ;;  %v6165_v24 = vld [vmem:[%s8412_s8 + $0x30c] ss:$16 sps:$4 sm:$0xff]   ;;  %v6160_v25 = vld [vmem:[%s8412_s8 + $0x108] ss:$16 sps:$4 sm:$0xff]  }
 0x4d7   : > { %v4003_v31 = vpop.f32.mrf.mxu0  ;;  %v4044_v62 = vpop.f32.mrf.mxu1  ;;  %v6163_v63 = vld [vmem:[%s8412_s8 + $0x308] ss:$16 sps:$4 sm:$0xff]   ;;  %v6174_v30 = vld [vmem:[%s8412_s8 + $0x4cc] ss:$16 sps:$4 sm:$0xff]  }
 0x4d8   : > { %4226 = vmatpush1.bf16.msra.mxu0 %v6106_v26  ;;  %v4004_v36 = vadd.f32 %v4003_v31, %v2034_v27  ;;  %v7780_v37 = vadd.f32 %v4042_v15, %v4002_v20  ;;  %v6168_v26 = vld [vmem:[%s8412_s8 + $0x4ec] ss:$16 sps:$4 sm:$0xff]   ;;  %v6175_v20 = vld [vmem:[%s8412_s8 + $0x6c8] ss:$16 sps:$4 sm:$0xff]  }
 0x4d9   : > { %4267 = vmatpush1.bf16.msra.mxu1 %v6109_v28  ;;  %4227 = vmatprep.subr.bf16.mxu0 %v6114_v29  ;;  %v4005_v43 = vpop.f32.mrf.mxu0  ;;  %v4046_v42 = vpop.f32.mrf.mxu1  ;;  %v6171_v27 = vld [vmem:[%s8412_s8 + $0x6ec] ss:$16 sps:$4 sm:$0xff]   ;;  %v6166_v28 = vld [vmem:[%s8412_s8 + $0x4e8] ss:$16 sps:$4 sm:$0xff]  }
 0x4da   : > { %4268 = vmatprep.subr.bf16.mxu1 %v6117_v32  ;;  %v7791_v45 = vadd.f32 %v4044_v62, %v4004_v36  ;;  %v6169_v29 = vld [vmem:[%s8412_s8 + $0x6e8] ss:$16 sps:$4 sm:$0xff]   ;;  %v6177_v15 = vld [vmem:[%s8412_s8 + $0x6cc] ss:$16 sps:$4 sm:$0xff]  }
 0x4db   : > { %v4006_v46 = vpop.f32.mrf.mxu0  ;;  %v4047_v47 = vpop.f32.mrf.mxu1  ;;  %v6172_v32 = vld [vmem:[%s8412_s8 + $0x4c8] ss:$16 sps:$4 sm:$0xff]   ;;  %v6189_v62 = vld [vmem:[%s8412_s8 + $0x68c] ss:$16 sps:$4 sm:$0xff]  }
 0x4dc   : > { %4228 = vmatpush1.bf16.msra.mxu0 %v6112_v35  ;;  %v6181_v31 = vld [vmem:[%s8412_s8 + $0x6a8] ss:$16 sps:$4 sm:$0xff]   ;;  %v6201_v46 = vld [vmem:[%s8412_s8 + $0x64c] ss:$16 sps:$4 sm:$0xff]  }
 0x4dd   : > { %4269 = vmatpush1.bf16.msra.mxu1 %v6115_v38  ;;  %4229 = vmatprep.subr.bf16.mxu0 %v6120_v41  ;;  %v6184_v35 = vld [vmem:[%s8412_s8 + $0x488] ss:$16 sps:$4 sm:$0xff]   ;;  %v6192_v38 = vld [vmem:[%s8412_s8 + $0x46c] ss:$16 sps:$4 sm:$0xff]  }
 0x4de   : > { %4270 = vmatprep.subr.bf16.mxu1 %v6123_v44  ;;  %v6187_v36 = vld [vmem:[%s8412_s8 + $0x688] ss:$16 sps:$4 sm:$0xff]   ;;  %v6195_v41 = vld [vmem:[%s8412_s8 + $0x66c] ss:$16 sps:$4 sm:$0xff]  }
 0x4df   : > { %v6190_v43 = vld [vmem:[%s8412_s8 + $0x468] ss:$16 sps:$4 sm:$0xff]   ;;  %v6198_v44 = vld [vmem:[%s8412_s8 + $0x44c] ss:$16 sps:$4 sm:$0xff]  }
 0x4e0   : > { %4230 = vmatpush2.bf16.msra.mxu0 %v6118_v48  ;;  %v6193_v42 = vld [vmem:[%s8412_s8 + $0x668] ss:$16 sps:$4 sm:$0xff]  }
 0x4e1   : > { %4271 = vmatpush2.bf16.msra.mxu1 %v6121_v49  ;;  %4231 = vmatprep.subr.bf16.mxu0 %v6126_v50  ;;  %v6196_v47 = vld [vmem:[%s8412_s8 + $0x448] ss:$16 sps:$4 sm:$0xff]   ;;  %v6204_v49 = vld [vmem:[%s8412_s8 + $0x42c] ss:$16 sps:$4 sm:$0xff]  }
 0x4e2   : > { %4272 = vmatprep.subr.bf16.mxu1 %v6129_v33  ;;  %v6199_v48 = vld [vmem:[%s8412_s8 + $0x648] ss:$16 sps:$4 sm:$0xff]   ;;  %v6207_v50 = vld [vmem:[%s8412_s8 + $0x62c] ss:$16 sps:$4 sm:$0xff]  }
 0x4e3   : > { %v6202_v33 = vld [vmem:[%s8412_s8 + $0x428] ss:$16 sps:$4 sm:$0xff]  }
 0x4e4   : > { %4232 = vmatpush2.bf16.msra.mxu0 %v6124_v51  ;;  %v6205_v51 = vld [vmem:[%s8412_s8 + $0x628] ss:$16 sps:$4 sm:$0xff]  }
 0x4e5   : > { %4273 = vmatpush2.bf16.msra.mxu1 %v6127_v54  ;;  %4233 = vmatprep.subr.bf16.mxu0 %v6132_v56  ;;  %v6210_v54 = vld [vmem:[%s8412_s8 + $0x40c] ss:$16 sps:$4 sm:$0xff]  }
 0x4e6   : > { %4274 = vmatprep.subr.bf16.mxu1 %v6135_v58  ;;  %v6213_v56 = vld [vmem:[%s8412_s8 + $0x60c] ss:$16 sps:$4 sm:$0xff]   ;;  %v6208_v58 = vld [vmem:[%s8412_s8 + $0x408] ss:$16 sps:$4 sm:$0xff]  }
 0x4e8   : > { %4234 = vmatpush2.bf16.msra.mxu0 %v6130_v59  ;;  %v6211_v59 = vld [vmem:[%s8412_s8 + $0x608] ss:$16 sps:$4 sm:$0xff]  }
 0x4e9   : > { %4275 = vmatpush2.bf16.msra.mxu1 %v6133_v60  ;;  %4235 = vmatprep.subr.bf16.mxu0 %v6138_v61  ;;  %v6216_v60 = vld [vmem:[%s8412_s8 + $0x5ec] ss:$16 sps:$4 sm:$0xff]  }
 0x4ea   : > { %4276 = vmatprep.subr.bf16.mxu1 %v6141_v0  ;;  %v6219_v61 = vld [vmem:[%s8412_s8 + $0x7ec] ss:$16 sps:$4 sm:$0xff]   ;;  %v6214_v0 = vld [vmem:[%s8412_s8 + $0x5e8] ss:$16 sps:$4 sm:$0xff]  }
 0x4ec   : > { %4236 = vmatpush2.bf16.msra.mxu0 %v6136_v22  ;;  %v6217_v22 = vld [vmem:[%s8412_s8 + $0x7e8] ss:$16 sps:$4 sm:$0xff]  }
 0x4ed   : > { %4277 = vmatpush2.bf16.msra.mxu1 %v6139_v1  ;;  %4237 = vmatprep.subr.bf16.mxu0 %v6144_v34  ;;  %v6222_v1 = vld [vmem:[%s8412_s8 + $0x5cc] ss:$16 sps:$4 sm:$0xff]  }
 0x4ee   : > { %4278 = vmatprep.subr.bf16.mxu1 %v6147_v2  ;;  %v6225_v34 = vld [vmem:[%s8412_s8 + $0x7cc] ss:$16 sps:$4 sm:$0xff]   ;;  %v6220_v2 = vld [vmem:[%s8412_s8 + $0x5c8] ss:$16 sps:$4 sm:$0xff]  }
 0x4f0   : > { %4238 = vmatpush2.bf16.msra.mxu0 %v6142_v3  ;;  %v6223_v3 = vld [vmem:[%s8412_s8 + $0x7c8] ss:$16 sps:$4 sm:$0xff]  }
 0x4f1   : > { %4279 = vmatpush2.bf16.msra.mxu1 %v6145_v4  ;;  %4239 = vmatprep.subr.bf16.mxu0 %v6150_v5  ;;  %v6228_v4 = vld [vmem:[%s8412_s8 + $0x5ac] ss:$16 sps:$4 sm:$0xff]  }
 0x4f2   : > { %4280 = vmatprep.subr.bf16.mxu1 %v6153_v8  ;;  %v6231_v5 = vld [vmem:[%s8412_s8 + $0x7ac] ss:$16 sps:$4 sm:$0xff]   ;;  %v6226_v8 = vld [vmem:[%s8412_s8 + $0x5a8] ss:$16 sps:$4 sm:$0xff]  }
 0x4f4   : > { %4240 = vmatpush2.bf16.msra.mxu0 %v6148_v12  ;;  %v6229_v12 = vld [vmem:[%s8412_s8 + $0x7a8] ss:$16 sps:$4 sm:$0xff]  }
 0x4f5   : > { %4281 = vmatpush2.bf16.msra.mxu1 %v6151_v13  ;;  %4241 = vmatprep.subr.bf16.mxu0 %v6156_v18  ;;  %v6234_v13 = vld [vmem:[%s8412_s8 + $0x58c] ss:$16 sps:$4 sm:$0xff]  }
 0x4f6   : > { %4282 = vmatprep.subr.bf16.mxu1 %v6159_v19  ;;  %v6237_v18 = vld [vmem:[%s8412_s8 + $0x78c] ss:$16 sps:$4 sm:$0xff]   ;;  %v6232_v19 = vld [vmem:[%s8412_s8 + $0x588] ss:$16 sps:$4 sm:$0xff]  }
 0x4f8   : > { %4242 = vmatpush2.bf16.msra.mxu0 %v6154_v57  ;;  %v6235_v57 = vld [vmem:[%s8412_s8 + $0x788] ss:$16 sps:$4 sm:$0xff]  }
 0x4f9   : > { %4283 = vmatpush2.bf16.msra.mxu1 %v6157_v21  ;;  %4243 = vmatprep.subr.bf16.mxu0 %v6162_v23  ;;  %v6240_v21 = vld [vmem:[%s8412_s8 + $0x56c] ss:$16 sps:$4 sm:$0xff]  }
 0x4fa   : > { %4284 = vmatprep.subr.bf16.mxu1 %v6165_v24  ;;  %v6243_v23 = vld [vmem:[%s8412_s8 + $0x76c] ss:$16 sps:$4 sm:$0xff]   ;;  %v6238_v24 = vld [vmem:[%s8412_s8 + $0x568] ss:$16 sps:$4 sm:$0xff]  }
 0x4fc   : > { %4244 = vmatpush2.bf16.msra.mxu0 %v6160_v25  ;;  %v6241_v25 = vld [vmem:[%s8412_s8 + $0x768] ss:$16 sps:$4 sm:$0xff]  }
 0x4fd   : > { %4285 = vmatpush2.bf16.msra.mxu1 %v6163_v63  ;;  %4295 = vmatprep.subr.bf16.mxu0 %v6168_v26  ;;  %v6246_v63 = vld [vmem:[%s8412_s8 + $0x54c] ss:$16 sps:$4 sm:$0xff]  }
 0x4fe   : > { %4336 = vmatprep.subr.bf16.mxu1 %v6171_v27  ;;  %v6249_v26 = vld [vmem:[%s8412_s8 + $0x74c] ss:$16 sps:$4 sm:$0xff]   ;;  %v6244_v27 = vld [vmem:[%s8412_s8 + $0x548] ss:$16 sps:$4 sm:$0xff]  }
 0x4ff   : > { %4246 = vmatmul.mubr.bf16.vlgmr.msra.gmra.mxu0 %v7242_v39  ;;  %v6180_v39 = vld [vmem:[%s8412_s8 + $0x4ac] ss:$16 sps:$4 sm:$0xff]  }
 0x500   : > { %4287 = vmatmul.mubr.bf16.vlgmr.msra.gmra.mxu1 %v7244_v40  ;;  %4296 = vmatpush1.bf16.msra.mxu0 %v6166_v28  ;;  %v6183_v40 = vld [vmem:[%s8412_s8 + $0x6ac] ss:$16 sps:$4 sm:$0xff]   ;;  %v6247_v28 = vld [vmem:[%s8412_s8 + $0x748] ss:$16 sps:$4 sm:$0xff]  }
 0x501   : > { %4327 = vmatprep.mubr.bf16.mxu0 %v7447_v9  ;;  %4337 = vmatpush1.bf16.msra.mxu1 %v6169_v29  ;;  %v6178_v9 = vld [vmem:[%s8412_s8 + $0x4a8] ss:$16 sps:$4 sm:$0xff]   ;;  %v6252_v29 = vld [vmem:[%s8412_s8 + $0x52c] ss:$16 sps:$4 sm:$0xff]  }
 0x502   : > { %4368 = vmatprep.mubr.bf16.mxu1 %v7449_v11  ;;  %4297 = vmatprep.subr.bf16.mxu0 %v6174_v30  ;;  %v6186_v11 = vld [vmem:[%s8412_s8 + $0x48c] ss:$16 sps:$4 sm:$0xff]  }
 0x503   : > { %4338 = vmatprep.subr.bf16.mxu1 %v6177_v15  ;;  %v6255_v30 = vld [vmem:[%s8412_s8 + $0x72c] ss:$16 sps:$4 sm:$0xff]   ;;  %v6250_v15 = vld [vmem:[%s8412_s8 + $0x528] ss:$16 sps:$4 sm:$0xff]  }
 0x504   : > { %4298 = vmatpush1.bf16.msra.mxu0 %v6172_v32  ;;  %v6253_v32 = vld [vmem:[%s8412_s8 + $0x728] ss:$16 sps:$4 sm:$0xff]  }
 0x505   : > { %4339 = vmatpush1.bf16.msra.mxu1 %v6175_v20  ;;  %4299 = vmatprep.subr.bf16.mxu0 %v6180_v39  ;;  %v6258_v20 = vld [vmem:[%s8412_s8 + $0x50c] ss:$16 sps:$4 sm:$0xff]  }
 0x506   : > { %4340 = vmatprep.subr.bf16.mxu1 %v6183_v40  ;;  %v6261_v39 = vld [vmem:[%s8412_s8 + $0x70c] ss:$16 sps:$4 sm:$0xff]   ;;  %v6256_v40 = vld [vmem:[%s8412_s8 + $0x508] ss:$16 sps:$4 sm:$0xff]  }
 0x508   : > { %4300 = vmatpush1.bf16.msra.mxu0 %v6178_v9  ;;  %v6259_v9 = vld [vmem:[%s8412_s8 + $0x708] ss:$16 sps:$4 sm:$0xff]  }
 0x509   : > { %4341 = vmatpush1.bf16.msra.mxu1 %v6181_v31  ;;  %4301 = vmatprep.subr.bf16.mxu0 %v6186_v11  ;;  %v6264_v31 = vld [vmem:[%s8412_s8 + $0x8ec] ss:$16 sps:$4 sm:$0xff]  }
 0x50a   : > { %4342 = vmatprep.subr.bf16.mxu1 %v6189_v62  ;;  %v6267_v11 = vld [vmem:[%s8412_s8 + $0xaec] ss:$16 sps:$4 sm:$0xff]   ;;  %v6262_v62 = vld [vmem:[%s8412_s8 + $0x8e8] ss:$16 sps:$4 sm:$0xff]  }
 0x50c   : > { %4302 = vmatpush1.bf16.msra.mxu0 %v6184_v35  ;;  %v6265_v35 = vld [vmem:[%s8412_s8 + $0xae8] ss:$16 sps:$4 sm:$0xff]  }
 0x50d   : > { %4343 = vmatpush1.bf16.msra.mxu1 %v6187_v36  ;;  %4303 = vmatprep.subr.bf16.mxu0 %v6192_v38  ;;  %v6270_v36 = vld [vmem:[%s8412_s8 + $0x8cc] ss:$16 sps:$4 sm:$0xff]  }
 0x50e   : > { %4344 = vmatprep.subr.bf16.mxu1 %v6195_v41 }
 0x510   : > { %4304 = vmatpush1.bf16.msra.mxu0 %v6190_v43  ;;  %v6273_v43 = vld [vmem:[%s8412_s8 + $0xacc] ss:$16 sps:$4 sm:$0xff]  }
 0x511   : > { %4345 = vmatpush1.bf16.msra.mxu1 %v6193_v42  ;;  %4305 = vmatprep.subr.bf16.mxu0 %v6198_v44  ;;  %v6268_v44 = vld [vmem:[%s8412_s8 + $0x8c8] ss:$16 sps:$4 sm:$0xff]  }
 0x512   : > { %4346 = vmatprep.subr.bf16.mxu1 %v6201_v46 }
 0x514   : > { %4306 = vmatpush1.bf16.msra.mxu0 %v6196_v47  ;;  %v6271_v47 = vld [vmem:[%s8412_s8 + $0xac8] ss:$16 sps:$4 sm:$0xff]  }
 0x515   : > { %4347 = vmatpush1.bf16.msra.mxu1 %v6199_v48  ;;  %4307 = vmatprep.subr.bf16.mxu0 %v6204_v49 }
 0x516   : > { %4348 = vmatprep.subr.bf16.mxu1 %v6207_v50  ;;  %v6274_v50 = vld [vmem:[%s8412_s8 + $0x8a8] ss:$16 sps:$4 sm:$0xff]  }
 0x518   : > { %4308 = vmatpush1.bf16.msra.mxu0 %v6202_v33 }
 0x519   : > { %4349 = vmatpush1.bf16.msra.mxu1 %v6205_v51  ;;  %4309 = vmatprep.subr.bf16.mxu0 %v6210_v54  ;;  %v6282_v54 = vld [vmem:[%s8412_s8 + $0x88c] ss:$16 sps:$4 sm:$0xff]  }
 0x51a   : > { %4350 = vmatprep.subr.bf16.mxu1 %v6213_v56  ;;  %v6285_v56 = vld [vmem:[%s8412_s8 + $0xa8c] ss:$16 sps:$4 sm:$0xff]  }
 0x51c   : > { %4310 = vmatpush1.bf16.msra.mxu0 %v6208_v58  ;;  %v6280_v58 = vld [vmem:[%s8412_s8 + $0x888] ss:$16 sps:$4 sm:$0xff]  }
 0x51d   : > { %4351 = vmatpush1.bf16.msra.mxu1 %v6211_v59  ;;  %4311 = vmatprep.subr.bf16.mxu0 %v6216_v60  ;;  %v6283_v59 = vld [vmem:[%s8412_s8 + $0xa88] ss:$16 sps:$4 sm:$0xff]   ;;  %v6288_v60 = vld [vmem:[%s8412_s8 + $0x86c] ss:$16 sps:$4 sm:$0xff]  }
 0x51e   : > { %4352 = vmatprep.subr.bf16.mxu1 %v6219_v61  ;;  %v6291_v61 = vld [vmem:[%s8412_s8 + $0xa6c] ss:$16 sps:$4 sm:$0xff]  }
 0x520   : > { %4312 = vmatpush2.bf16.msra.mxu0 %v6214_v0  ;;  %v6286_v0 = vld [vmem:[%s8412_s8 + $0x868] ss:$16 sps:$4 sm:$0xff]  }
 0x521   : > { %4353 = vmatpush2.bf16.msra.mxu1 %v6217_v22  ;;  %4313 = vmatprep.subr.bf16.mxu0 %v6222_v1  ;;  %v6289_v22 = vld [vmem:[%s8412_s8 + $0xa68] ss:$16 sps:$4 sm:$0xff]   ;;  %v6294_v1 = vld [vmem:[%s8412_s8 + $0x84c] ss:$16 sps:$4 sm:$0xff]  }
 0x522   : > { %4354 = vmatprep.subr.bf16.mxu1 %v6225_v34  ;;  %v6297_v34 = vld [vmem:[%s8412_s8 + $0xa4c] ss:$16 sps:$4 sm:$0xff]  }
 0x524   : > { %4314 = vmatpush2.bf16.msra.mxu0 %v6220_v2  ;;  %v6292_v2 = vld [vmem:[%s8412_s8 + $0x848] ss:$16 sps:$4 sm:$0xff]  }
 0x525   : > { %4355 = vmatpush2.bf16.msra.mxu1 %v6223_v3  ;;  %4315 = vmatprep.subr.bf16.mxu0 %v6228_v4  ;;  %v6295_v3 = vld [vmem:[%s8412_s8 + $0xa48] ss:$16 sps:$4 sm:$0xff]   ;;  %v6300_v4 = vld [vmem:[%s8412_s8 + $0x82c] ss:$16 sps:$4 sm:$0xff]  }
 0x526   : > { %4356 = vmatprep.subr.bf16.mxu1 %v6231_v5  ;;  %v6303_v5 = vld [vmem:[%s8412_s8 + $0xa2c] ss:$16 sps:$4 sm:$0xff]  }
 0x528   : > { %4316 = vmatpush2.bf16.msra.mxu0 %v6226_v8  ;;  %v6298_v8 = vld [vmem:[%s8412_s8 + $0x828] ss:$16 sps:$4 sm:$0xff]  }
 0x529   : > { %4357 = vmatpush2.bf16.msra.mxu1 %v6229_v12  ;;  %4317 = vmatprep.subr.bf16.mxu0 %v6234_v13  ;;  %v6301_v12 = vld [vmem:[%s8412_s8 + $0xa28] ss:$16 sps:$4 sm:$0xff]   ;;  %v6306_v13 = vld [vmem:[%s8412_s8 + $0x80c] ss:$16 sps:$4 sm:$0xff]  }
 0x52a   : > { %4358 = vmatprep.subr.bf16.mxu1 %v6237_v18  ;;  %v6309_v18 = vld [vmem:[%s8412_s8 + $0xa0c] ss:$16 sps:$4 sm:$0xff]  }
 0x52c   : > { %4318 = vmatpush2.bf16.msra.mxu0 %v6232_v19  ;;  %v6304_v19 = vld [vmem:[%s8412_s8 + $0x808] ss:$16 sps:$4 sm:$0xff]  }
 0x52d   : > { %4359 = vmatpush2.bf16.msra.mxu1 %v6235_v57  ;;  %4319 = vmatprep.subr.bf16.mxu0 %v6240_v21  ;;  %v6307_v57 = vld [vmem:[%s8412_s8 + $0xa08] ss:$16 sps:$4 sm:$0xff]   ;;  %v6312_v21 = vld [vmem:[%s8412_s8 + $0x9ec] ss:$16 sps:$4 sm:$0xff]  }
 0x52e   : > { %4360 = vmatprep.subr.bf16.mxu1 %v6243_v23  ;;  %v6315_v23 = vld [vmem:[%s8412_s8 + $0xbec] ss:$16 sps:$4 sm:$0xff]  }
 0x530   : > { %4320 = vmatpush2.bf16.msra.mxu0 %v6238_v24  ;;  %v6310_v24 = vld [vmem:[%s8412_s8 + $0x9e8] ss:$16 sps:$4 sm:$0xff]  }
 0x531   : > { %4361 = vmatpush2.bf16.msra.mxu1 %v6241_v25  ;;  %4321 = vmatprep.subr.bf16.mxu0 %v6246_v63  ;;  %v6313_v25 = vld [vmem:[%s8412_s8 + $0xbe8] ss:$16 sps:$4 sm:$0xff]   ;;  %v6318_v63 = vld [vmem:[%s8412_s8 + $0x9cc] ss:$16 sps:$4 sm:$0xff]  }
 0x532   : > { %4362 = vmatprep.subr.bf16.mxu1 %v6249_v26  ;;  %v6321_v26 = vld [vmem:[%s8412_s8 + $0xbcc] ss:$16 sps:$4 sm:$0xff]  }
 0x534   : > { %4322 = vmatpush2.bf16.msra.mxu0 %v6244_v27  ;;  %v6316_v27 = vld [vmem:[%s8412_s8 + $0x9c8] ss:$16 sps:$4 sm:$0xff]  }
 0x535   : > { %4363 = vmatpush2.bf16.msra.mxu1 %v6247_v28  ;;  %4323 = vmatprep.subr.bf16.mxu0 %v6252_v29  ;;  %v6319_v28 = vld [vmem:[%s8412_s8 + $0xbc8] ss:$16 sps:$4 sm:$0xff]   ;;  %v6324_v29 = vld [vmem:[%s8412_s8 + $0x9ac] ss:$16 sps:$4 sm:$0xff]  }
 0x536   : > { %4364 = vmatprep.subr.bf16.mxu1 %v6255_v30  ;;  %v6327_v30 = vld [vmem:[%s8412_s8 + $0xbac] ss:$16 sps:$4 sm:$0xff]  }
 0x538   : > { %4324 = vmatpush2.bf16.msra.mxu0 %v6250_v15  ;;  %v6322_v15 = vld [vmem:[%s8412_s8 + $0x9a8] ss:$16 sps:$4 sm:$0xff]  }
 0x539   : > { %4365 = vmatpush2.bf16.msra.mxu1 %v6253_v32  ;;  %4325 = vmatprep.subr.bf16.mxu0 %v6258_v20  ;;  %v6325_v32 = vld [vmem:[%s8412_s8 + $0xba8] ss:$16 sps:$4 sm:$0xff]   ;;  %v6330_v20 = vld [vmem:[%s8412_s8 + $0x98c] ss:$16 sps:$4 sm:$0xff]  }
 0x53a   : > { %4366 = vmatprep.subr.bf16.mxu1 %v6261_v39  ;;  %v6333_v39 = vld [vmem:[%s8412_s8 + $0xb8c] ss:$16 sps:$4 sm:$0xff]  }
 0x53c   : > { %4326 = vmatpush2.bf16.msra.mxu0 %v6256_v40  ;;  %v6328_v40 = vld [vmem:[%s8412_s8 + $0x988] ss:$16 sps:$4 sm:$0xff]  }
 0x53d   : > { %4367 = vmatpush2.bf16.msra.mxu1 %v6259_v9  ;;  %4377 = vmatprep.subr.bf16.mxu0 %v6264_v31  ;;  %v6331_v9 = vld [vmem:[%s8412_s8 + $0xb88] ss:$16 sps:$4 sm:$0xff]   ;;  %v6336_v31 = vld [vmem:[%s8412_s8 + $0x96c] ss:$16 sps:$4 sm:$0xff]  }
 0x53e   : > { %4418 = vmatprep.subr.bf16.mxu1 %v6267_v11  ;;  %v6339_v11 = vld [vmem:[%s8412_s8 + $0xb6c] ss:$16 sps:$4 sm:$0xff]  }
 0x53f   : > { %4328 = vmatmul.mubr.bf16.vlgmr.msra.gmra.mxu0 %v7457_v14  ;;  %v4083_v38 = vpop.f32.mrf.mxu0  ;;  %v4124_v41 = vpop.f32.mrf.mxu1 }
 0x540   : > { %4369 = vmatmul.mubr.bf16.vlgmr.msra.gmra.mxu1 %v7459_v17  ;;  %v4084_v42 = vadd.f32 %v4083_v38, %v7780_v37  ;;  %4378 = vmatpush1.bf16.msra.mxu0 %v6262_v62  ;;  %v6276_v17 = vld [vmem:[%s8412_s8 + $0x8ac] ss:$16 sps:$4 sm:$0xff]   ;;  %v6334_v62 = vld [vmem:[%s8412_s8 + $0x968] ss:$16 sps:$4 sm:$0xff]  }
 0x541   : > { %4409 = vmatprep.mubr.bf16.mxu0 %v7574_v6  ;;  %4419 = vmatpush1.bf16.msra.mxu1 %v6265_v35  ;;  %v8104_v46 = vpop.f32.mrf.mxu0  ;;  %v8106_v14 = vpop.f32.mrf.mxu1  ;;  %v6279_v6 = vld [vmem:[%s8412_s8 + $0xaac] ss:$16 sps:$4 sm:$0xff]   ;;  %v6337_v35 = vld [vmem:[%s8412_s8 + $0xb68] ss:$16 sps:$4 sm:$0xff]  }
 0x542   : > { %v8114_v37 = vadd.f32 %v4124_v41, %v4084_v42  ;;  %4450 = vmatprep.mubr.bf16.mxu1 %v7576_v7  ;;  %4379 = vmatprep.subr.bf16.mxu0 %v6270_v36  ;;  %v6277_v7 = vld [vmem:[%s8412_s8 + $0xaa8] ss:$16 sps:$4 sm:$0xff]   ;;  %v6342_v36 = vld [vmem:[%s8412_s8 + $0x94c] ss:$16 sps:$4 sm:$0xff]  }
 0x543   : > { %4420 = vmatprep.subr.bf16.mxu1 %v6273_v43  ;;  %v4087_v48 = vpop.f32.mrf.mxu0  ;;  %v4128_v49 = vpop.f32.mrf.mxu1  ;;  %v6345_v38 = vld [vmem:[%s8412_s8 + $0xb4c] ss:$16 sps:$4 sm:$0xff]   ;;  %v6340_v41 = vld [vmem:[%s8412_s8 + $0x948] ss:$16 sps:$4 sm:$0xff]  }
 0x544   : > { %4380 = vmatpush1.bf16.msra.mxu0 %v6268_v44  ;;  %v6343_v43 = vld [vmem:[%s8412_s8 + $0xb48] ss:$16 sps:$4 sm:$0xff]   ;;  %v6348_v42 = vld [vmem:[%s8412_s8 + $0x92c] ss:$16 sps:$4 sm:$0xff]  }
 0x545   : > { %4421 = vmatpush1.bf16.msra.mxu1 %v6271_v47  ;;  %v4088_v33 = vpop.f32.mrf.mxu0  ;;  %v4129_v51 = vpop.f32.mrf.mxu1  ;;  %4381 = vmatprep.subr.bf16.mxu0 %v6276_v17  ;;  %v6351_v44 = vld [vmem:[%s8412_s8 + $0xb2c] ss:$16 sps:$4 sm:$0xff]   ;;  %v6346_v47 = vld [vmem:[%s8412_s8 + $0x928] ss:$16 sps:$4 sm:$0xff]  }
 0x546   : > { %4422 = vmatprep.subr.bf16.mxu1 %v6279_v6  ;;  %v6349_v17 = vld [vmem:[%s8412_s8 + $0xb28] ss:$16 sps:$4 sm:$0xff]   ;;  %v6354_v6 = vld [vmem:[%s8412_s8 + $0x90c] ss:$16 sps:$4 sm:$0xff]   ;;  %v4086_v51 = vadd.f32 %v8104_v46, %v7791_v45  ;;  %v6361_v45 = vld [vmem:[%s8413_s9 + $0x30] sm:$0xff]  }
 0x547   : > { %v6357_v48 = vld [vmem:[%s8412_s8 + $0xb0c] ss:$16 sps:$4 sm:$0xff]   ;;  %v6352_v49 = vld [vmem:[%s8412_s8 + $0x908] ss:$16 sps:$4 sm:$0xff]  }
 0x548   : > { %4382 = vmatpush1.bf16.msra.mxu0 %v6274_v50  ;;  %v6355_v50 = vld [vmem:[%s8412_s8 + $0xb08] ss:$16 sps:$4 sm:$0xff]  }
 0x549   : > { %4423 = vmatpush1.bf16.msra.mxu1 %v6277_v7  ;;  %4383 = vmatprep.subr.bf16.mxu0 %v6282_v54  ;;  %v6358_v33 = vld [vmem:[%s8413_s9 + $0x78] sm:$0xff]   ;;  %v6360_v54 = vld [vmem:[%s8413_s9 + $0x70] sm:$0xff]  }
 0x54a   : > { %4424 = vmatprep.subr.bf16.mxu1 %v6285_v56  ;;  %v6359_v7 = vld [vmem:[%s8413_s9 + $0x38] sm:$0xff]  }
 0x54c   : > { %4384 = vmatpush1.bf16.msra.mxu0 %v6280_v58 }
 0x54d   : > { %4425 = vmatpush1.bf16.msra.mxu1 %v6283_v59  ;;  %4385 = vmatprep.subr.bf16.mxu0 %v6288_v60  ;;  %v4127_v59 = vadd.f32 %v8106_v14, %v4086_v51 }
 0x54e   : > { %4426 = vmatprep.subr.bf16.mxu1 %v6291_v61  ;;  %v6362_v61 = vld [vmem:[%s8413_s9 + $0x68] sm:$0xff]  }
 0x550   : > { %4386 = vmatpush1.bf16.msra.mxu0 %v6286_v0 }
 0x551   : > { %4427 = vmatpush1.bf16.msra.mxu1 %v6289_v22  ;;  %4387 = vmatprep.subr.bf16.mxu0 %v6294_v1 }
 0x552   : > { %4428 = vmatprep.subr.bf16.mxu1 %v6297_v34 }
 0x554   : > { %4388 = vmatpush1.bf16.msra.mxu0 %v6292_v2  ;;  %v6364_v2 = vld [vmem:[%s8413_s9 + $0x60] sm:$0xff]  }
 0x555   : > { %4429 = vmatpush1.bf16.msra.mxu1 %v6295_v3  ;;  %4389 = vmatprep.subr.bf16.mxu0 %v6300_v4  ;;  %v6374_v4 = vld [vmem:[%s8413_s9 + $0xf8] sm:$0xff]  }
 0x556   : > { %4430 = vmatprep.subr.bf16.mxu1 %v6303_v5  ;;  %v6375_v5 = vld [vmem:[%s8413_s9 + $0xb8] sm:$0xff]  }
 0x558   : > { %4390 = vmatpush1.bf16.msra.mxu0 %v6298_v8  ;;  %v6376_v8 = vld [vmem:[%s8413_s9 + $0xf0] sm:$0xff]  }
 0x559   : > { %4431 = vmatpush1.bf16.msra.mxu1 %v6301_v12  ;;  %4391 = vmatprep.subr.bf16.mxu0 %v6306_v13  ;;  %v6365_v13 = vld [vmem:[%s8413_s9 + $0x20] sm:$0xff]  }
 0x55a   : > { %4432 = vmatprep.subr.bf16.mxu1 %v6309_v18  ;;  %v6366_v18 = vld [vmem:[%s8413_s9 + $0x58] sm:$0xff]  }
 0x55c   : > { %4392 = vmatpush1.bf16.msra.mxu0 %v6304_v19  ;;  %v6377_v19 = vld [vmem:[%s8413_s9 + $0xb0] sm:$0xff]  }
 0x55d   : > { %4433 = vmatpush1.bf16.msra.mxu1 %v6307_v57  ;;  %4393 = vmatprep.subr.bf16.mxu0 %v6312_v21  ;;  %v6378_v57 = vld [vmem:[%s8413_s9 + $0xe8] sm:$0xff]   ;;  %v6367_v21 = vld [vmem:[%s8413_s9 + $0x18] sm:$0xff]  }
 0x55e   : > { %4434 = vmatprep.subr.bf16.mxu1 %v6315_v23  ;;  %v6368_v23 = vld [vmem:[%s8413_s9 + $0x50] sm:$0xff]  }
 0x560   : > { %4394 = vmatpush2.bf16.msra.mxu0 %v6310_v24  ;;  %v6379_v24 = vld [vmem:[%s8413_s9 + $0xa8] sm:$0xff]  }
 0x561   : > { %4435 = vmatpush2.bf16.msra.mxu1 %v6313_v25  ;;  %4395 = vmatprep.subr.bf16.mxu0 %v6318_v63  ;;  %v6380_v25 = vld [vmem:[%s8413_s9 + $0xe0] sm:$0xff]   ;;  %v6369_v63 = vld [vmem:[%s8413_s9 + $0x10] sm:$0xff]  }
 0x562   : > { %4436 = vmatprep.subr.bf16.mxu1 %v6321_v26 }
 0x564   : > { %4396 = vmatpush2.bf16.msra.mxu0 %v6316_v27  ;;  %v6370_v27 = vld [vmem:[%s8413_s9 + $0x48] sm:$0xff]  }
 0x565   : > { %4437 = vmatpush2.bf16.msra.mxu1 %v6319_v28  ;;  %4397 = vmatprep.subr.bf16.mxu0 %v6324_v29  ;;  %v6381_v28 = vld [vmem:[%s8413_s9 + $0xa0] sm:$0xff]   ;;  %v6382_v29 = vld [vmem:[%s8413_s9 + $0xd8] sm:$0xff]  }
 0x566   : > { %4438 = vmatprep.subr.bf16.mxu1 %v6327_v30 }
 0x568   : > { %4398 = vmatpush2.bf16.msra.mxu0 %v6322_v15  ;;  %v6372_v15 = vld [vmem:[%s8413_s9 + $0x40] sm:$0xff]  }
 0x569   : > { %4439 = vmatpush2.bf16.msra.mxu1 %v6325_v32  ;;  %4399 = vmatprep.subr.bf16.mxu0 %v6330_v20  ;;  %v6383_v32 = vld [vmem:[%s8413_s9 + $0x98] sm:$0xff]   ;;  %v6373_v20 = vld [vmem:[%s8413_s9] sm:$0xff]  }
 0x56a   : > { %4440 = vmatprep.subr.bf16.mxu1 %v6333_v39 }
 0x56c   : > { %4400 = vmatpush2.bf16.msra.mxu0 %v6328_v40 }
 0x56d   : > { %4441 = vmatpush2.bf16.msra.mxu1 %v6331_v9  ;;  %4401 = vmatprep.subr.bf16.mxu0 %v6336_v31  ;;  %v2038_v9 = vrot.slane %v7747_v53, %v7186_v16  ;;  %v2042_v31 = vrot.slane %v7747_v53, %v7012_v10  ;;  %v6386_v10 = vld [vmem:[%s8413_s9 + $0xc8] sm:$0xff]  }
 0x56e   : > { %4442 = vmatprep.subr.bf16.mxu1 %v6339_v11 }
 0x570   : > { %4402 = vmatpush2.bf16.msra.mxu0 %v6334_v62  ;;  %v6384_v62 = vld [vmem:[%s8413_s9 + $0xd0] sm:$0xff]  }
 0x571   : > { %4443 = vmatpush2.bf16.msra.mxu1 %v6337_v35  ;;  %4403 = vmatprep.subr.bf16.mxu0 %v6342_v36 }
 0x572   : > { %4444 = vmatprep.subr.bf16.mxu1 %v6345_v38  ;;  %v6385_v38 = vld [vmem:[%s8413_s9 + $0x90] sm:$0xff]  }
 0x574   : > { %4404 = vmatpush2.bf16.msra.mxu0 %v6340_v41 }
 0x575   : > { %4445 = vmatpush2.bf16.msra.mxu1 %v6343_v43  ;;  %4405 = vmatprep.subr.bf16.mxu0 %v6348_v42 }
 0x576   : > { %4446 = vmatprep.subr.bf16.mxu1 %v6351_v44 }
 0x578   : > { %4406 = vmatpush2.bf16.msra.mxu0 %v6346_v47 }
 0x579   : > { %4447 = vmatpush2.bf16.msra.mxu1 %v6349_v17  ;;  %4407 = vmatprep.subr.bf16.mxu0 %v6354_v6  ;;  %v6387_v17 = vld [vmem:[%s8413_s9 + $0x88] sm:$0xff]  }
 0x57a   : > { %4448 = vmatprep.subr.bf16.mxu1 %v6357_v48 }
 0x57c   : > { %4408 = vmatpush2.bf16.msra.mxu0 %v6352_v49  ;;  %v6388_v49 = vld [vmem:[%s8413_s9 + $0xc0] sm:$0xff]  }
 0x57d   : > { %4449 = vmatpush2.bf16.msra.mxu1 %v6355_v50  ;;  %5546 = vmatprep.subr.bf16.mxu0 %v6358_v33  ;;  %v6389_v50 = vld [vmem:[%s8413_s9 + $0x80] sm:$0xff]  }
 0x57e   : > { %5568 = vmatprep.subr.bf16.mxu1 %v6374_v4 }
 0x57f   : > { %v4165_v56 = vpop.f32.mrf.mxu0  ;;  %v4206_v58 = vpop.f32.mrf.mxu1  ;;  %4410 = vmatmul.mubr.bf16.vlgmr.msra.gmra.mxu0 %v7681_v55 }
 0x580   : > { %4451 = vmatmul.mubr.bf16.vlgmr.msra.gmra.mxu1 %v7676_v52  ;;  %5547 = vmatpush3.bf16.msra.mxu0 %v6359_v7  ;;  %v6363_v52 = vld [vmem:[%s8413_s9 + $0x28] sm:$0xff]   ;;  %v4166_v26 = vadd.f32 %v4165_v56, %v8114_v37 }
 0x581   : > { %v4167_v46 = vpop.f32.mrf.mxu0  ;;  %v4208_v60 = vpop.f32.mrf.mxu1  ;;  %5548 = vmatprep.subr.bf16.mxu0 %v6360_v54  ;;  %5569 = vmatpush3.bf16.msra.mxu1 %v6375_v5  ;;  %v6371_v37 = vld [vmem:[%s8413_s9 + $0x8] sm:$0xff]  }
 0x582   : > { %v4168_v0 = vadd.f32 %v4167_v46, %v4127_v59  ;;  %5570 = vmatprep.subr.bf16.mxu1 %v6376_v8  ;;  %v4207_v30 = vadd.f32 %v4206_v58, %v4166_v26  ;;  %v5457_v26 = vld [vmem:[%s8414_s10] ss:$0 sm:$0xff] }
 0x583   : > { %v4169_v22 = vpop.f32.mrf.mxu0  ;;  %v4210_v1 = vpop.f32.mrf.mxu1 }
 0x584   : > { %v4209_v55 = vadd.f32 %v4208_v60, %v4168_v0  ;;  %5549 = vmatpush3.bf16.msra.mxu0 %v6361_v45  ;;  %v4459_v39 = vmax.f32 %v4207_v30, 0.0 }
 0x585   : > { %v4170_v14 = vpop.f32.mrf.mxu0  ;;  %v4211_v34 = vpop.f32.mrf.mxu1  ;;  %5550 = vmatprep.subr.bf16.mxu0 %v6362_v61  ;;  %5571 = vmatpush3.bf16.msra.mxu1 %v6377_v19 }
 0x586   : > { %v4460_v3 = vmax.f32 %v4209_v55, 0.0  ;;  %5572 = vmatprep.subr.bf16.mxu1 %v6378_v57  ;;  %v4463_v40 = vpack.c.bf16 %v4459_v39, %v4459_v39 }
 0x588   : > { %v4464_v12 = vpack.c.bf16 %v4460_v3, %v4460_v3  ;;  %5551 = vmatpush3.bf16.msra.mxu0 %v6363_v52 }
 0x589   : > { %5552 = vmatprep.subr.bf16.mxu0 %v6364_v2  ;;  %5573 = vmatpush3.bf16.msra.mxu1 %v6379_v24 }
 0x58a   : > { %4760 = vmatprep.mubr.bf16.mxu0 %v4464_v12  ;;  %5574 = vmatprep.subr.bf16.mxu1 %v6380_v25 }
 0x58c   : > { %5553 = vmatpush3.bf16.msra.mxu0 %v6365_v13 }
 0x58d   : > { %5554 = vmatprep.subr.bf16.mxu0 %v6366_v18  ;;  %5575 = vmatpush3.bf16.msra.mxu1 %v6381_v28 }
 0x58e   : > { %5576 = vmatprep.subr.bf16.mxu1 %v6382_v29 }
 0x590   : > { %5555 = vmatpush3.bf16.msra.mxu0 %v6367_v21 }
 0x591   : > { %5556 = vmatprep.subr.bf16.mxu0 %v6368_v23  ;;  %5577 = vmatpush3.bf16.msra.mxu1 %v6383_v32 }
 0x592   : > { %5578 = vmatprep.subr.bf16.mxu1 %v6384_v62 }
 0x594   : > { %5557 = vmatpush3.bf16.msra.mxu0 %v6369_v63 }
 0x595   : > { %5558 = vmatprep.subr.bf16.mxu0 %v6370_v27  ;;  %5579 = vmatpush3.bf16.msra.mxu1 %v6385_v38 }
 0x596   : > { %5580 = vmatprep.subr.bf16.mxu1 %v6386_v10 }
 0x598   : > { %5559 = vmatpush3.bf16.msra.mxu0 %v6371_v37 }
 0x599   : > { %5560 = vmatprep.subr.bf16.mxu0 %v6372_v15  ;;  %5581 = vmatpush3.bf16.msra.mxu1 %v6387_v17 }
 0x59a   : > { %5582 = vmatprep.subr.bf16.mxu1 %v6388_v49 }
 0x59c   : > { %5561 = vmatpush3.bf16.msra.mxu0 %v6373_v20  ;;  %v5490_v20 = vld [vmem:[%s8414_s10 + $0x1] ss:$0 sm:$0xff] }
 0x59d   : > { %5583 = vmatpush3.bf16.msra.mxu1 %v6389_v50 }
 0x59f   : > { %4761 = vmatmul.mubr.bf16.vlgmr.msra.gmra.mxu0 %v4463_v40 }
 0x5bf   : > { %v4247_v11 = vpop.f32.mrf.mxu0 }
 0x5c0   : > { %v4248_v35 = vadd.f32 %v4247_v11, %v2038_v9  ;;  %v4288_v36 = vpop.f32.mrf.mxu1 }
 0x5c1   : > { %v4249_v41 = vpop.f32.mrf.mxu0 }
 0x5c2   : > { %v4289_v43 = vadd.f32 %v4288_v36, %v4248_v35  ;;  %v4250_v42 = vadd.f32 %v4249_v41, %v2042_v31  ;;  %v4290_v44 = vpop.f32.mrf.mxu1  ;;  %v5491_v31 = vld [vmem:[%s8414_s10 + $0x2] ss:$0 sm:$0xff] }
 0x5c3   : > { %v4251_v16 = vpop.f32.mrf.mxu0 }
 0x5c4   : > { %v4291_v53 = vadd.f32 %v4290_v44, %v4250_v42  ;;  %v4292_v47 = vpop.f32.mrf.mxu1 }
 0x5c5   : > { %v4252_v6 = vpop.f32.mrf.mxu0 }
 0x5c6   : > { %v4293_v48 = vpop.f32.mrf.mxu1 }
 0x5ff   : > { %v4329_v33 = vpop.f32.mrf.mxu0 }
 0x600   : > { %v4330_v51 = vadd.f32 %v4329_v33, %v4289_v43  ;;  %v4370_v7 = vpop.f32.mrf.mxu1 }
 0x601   : > { %v4331_v54 = vpop.f32.mrf.mxu0 }
 0x602   : > { %v4371_v56 = vadd.f32 %v4370_v7, %v4330_v51  ;;  %v4372_v58 = vpop.f32.mrf.mxu1  ;;  %v4332_v61 = vadd.f32 %v4331_v54, %v4291_v53 }
 0x603   : > { %v4333_v59 = vpop.f32.mrf.mxu0 }
 0x604   : > { %v4374_v45 = vpop.f32.mrf.mxu1  ;;  %v4373_v22 = vadd.f32 %v4372_v58, %v4332_v61 }
 0x605   : > { %v4334_v46 = vpop.f32.mrf.mxu0 }
 0x606   : > { %v4375_v60 = vpop.f32.mrf.mxu1 }
 0x63f   : > { %v4411_v0 = vpop.f32.mrf.mxu0 }
 0x640   : > { %v4412_v1 = vadd.f32 %v4411_v0, %v4371_v56  ;;  %v4452_v55 = vpop.f32.mrf.mxu1 }
 0x641   : > { %v4413_v52 = vpop.f32.mrf.mxu0 }
 0x642   : > { %v4453_v14 = vadd.f32 %v4452_v55, %v4412_v1  ;;  %v4414_v34 = vadd.f32 %v4413_v52, %v4373_v22  ;;  %v4454_v2 = vpop.f32.mrf.mxu1 }
 0x643   : > { %v4415_v3 = vpop.f32.mrf.mxu0 }
 0x644   : > { %v4455_v4 = vadd.f32 %v4454_v2, %v4414_v34  ;;  %v4456_v5 = vpop.f32.mrf.mxu1  ;;  %v4461_v8 = vmax.f32 %v4453_v14, 0.0 }
 0x645   : > { %v4416_v12 = vpop.f32.mrf.mxu0 }
 0x646   : > { %v4462_v13 = vmax.f32 %v4455_v4, 0.0  ;;  %v4457_v18 = vpop.f32.mrf.mxu1  ;;  %v4465_v57 = vpack.c.bf16 %v4461_v8, %v4461_v8 }
 0x648   : > { %v4466_v19 = vpack.c.bf16 %v4462_v13, %v4462_v13 }
 0x64a   : > { %4800 = vmatprep.mubr.bf16.mxu1 %v4466_v19 }
 0x64b   : > { %4801 = vmatmul.mubr.bf16.vlgmr.msra.gmra.mxu1 %v4465_v57 }
 0x65f   : > { %v5562_v21 = vpop.f32.mrf.mxu0 }
 0x661   : > { %v5563_v23 = vpop.f32.mrf.mxu0 }
 0x662   : > { %v5564_v24 = vadd.f32 %v5563_v23, %v5562_v21 }
 0x663   : > { %v5565_v25 = vpop.f32.mrf.mxu0 }
 0x664   : > { %v4763_v29 = vadd.f32 %v5564_v24, %v5457_v26 }
 0x665   : > { %v5566_v63 = vpop.f32.mrf.mxu0 }
 0x70b   : > { %v5584_v27 = vpop.f32.mrf.mxu1 }
 0x70d   : > { %v5585_v28 = vpop.f32.mrf.mxu1 }
 0x70e   : > { %v5586_v37 = vadd.f32 %v5585_v28, %v5584_v27 }
 0x70f   : > { %v5587_v30 = vpop.f32.mrf.mxu1 }
 0x710   : > { %v4803_v15 = vadd.f32 %v5586_v37, %v4763_v29 }
 0x711   : > { %v5588_v32 = vpop.f32.mrf.mxu1 }
 0x712   : > { %v4808_v39 = vmax.f32 %v4803_v15, 0.0 }
 0x714   : > { %v4814_v40 = vmul.f32 %v5490_v20, %v4808_v39 }
 0x716   : > { %v4816_v9 = vsel %vm4815_vm2, %v4814_v40, 0.0 }
 0x717   : > { %4817 = vadd.xlane.f32.xlu1 %v4816_v9 }
 0x7a0   : > { %v4818_v11 = vpop.xlane.xlu1 %4817 }
 0x7a1   : > { %v4824_v62 = vadd.f32 %v5491_v31, %v4818_v11 }
 0x7a3   : > { %4827 = vperm.xlu1 %5636, %v4824_v62  }
 0x81e   : > { %v4828_v35 = vpop.permute.xlu1 %4827 }
 0x81f   : > { %4830 = vst [vmem:[%s398_s23] sm:$0xff] %v4828_v35 }
 0x820 PF: > { %s21_s17 = sadd.s32 1, %s6400_s17  }
 0x821   : > { %p18_p4 = scmp.ge.s32.totalorder %s21_s17, 4  }
 0x823   :  { %20 = sbr.rel (!%p18_p4) target bundleno = 1 (0x1), region = 102 }

</bundles_post_ra>
